<compile_context>
chip_gen: v7x
topology: tpu7x:2x2x1
jax: 0.10.0
libtpu: 0.0.40
codegen_flags: <defaults>
</compile_context>

<pallas_src>
import jax
import jax.numpy as jnp
from jax.experimental import pallas as pl
from jax.experimental.pallas import tpu as pltpu


# ----------------------------------------------------------------------------
# Pallas kernel: one batch tile per grid step, everything resident in VMEM.
# ----------------------------------------------------------------------------
def _bottleneck_kernel(
    x_ref,                                   # (Bt, H, W, Cin)   f32
    w1a_ref, w1b_ref, b1a_ref, b1b_ref,      # conv1 halves (bf16, BN folded) + bias
    th_ref, bh_ref, thh_ref, bhh_ref,        # (1,3) depthwise taps (scale folded) + bias
    tv_ref, bv_ref, tvv_ref, bvv_ref,        # (3,1) depthwise taps (scale folded) + bias
    w3a_ref, w3b_ref, w3c_ref, w3d_ref,      # conv3 row blocks (bf16, BN folded)
    b3_ref,                                  # bn3 bias
    o_ref,                                   # (Bt, H, W, Cout)  f32
):
    Bt, H, W, Cin = x_ref.shape
    ph = w1a_ref.shape[1]
    M = Bt * H * W

    x = x_ref[...]                                       # f32 residual
    xb = x.reshape(M, Cin).astype(jnp.bfloat16)          # bf16 MXU operand

    # ---- conv1 (1x1) + folded bn1 + relu, split into the two channel halves.
    o1 = jnp.maximum(
        jnp.dot(xb, w1a_ref[...], preferred_element_type=jnp.float32)
        + b1a_ref[...], 0.0).reshape(Bt, H, W, ph)
    o2 = jnp.maximum(
        jnp.dot(xb, w1b_ref[...], preferred_element_type=jnp.float32)
        + b1b_ref[...], 0.0).reshape(Bt, H, W, ph)

    # ---- shifted copies (zero-padded), built once and shared by both branches.
    zw = jnp.zeros((Bt, H, 1, ph), jnp.float32)
    left = jnp.concatenate([zw, o1[:, :, :-1, :]], axis=2)     # o1[., ., w-1, .]
    right = jnp.concatenate([o1[:, :, 1:, :], zw], axis=2)     # o1[., ., w+1, .]
    zh = jnp.zeros((Bt, 1, W, ph), jnp.float32)
    up = jnp.concatenate([zh, o2[:, :-1, :, :]], axis=1)       # o2[., h-1, ., .]
    down = jnp.concatenate([o2[:, 1:, :, :], zh], axis=1)      # o2[., h+1, ., .]

    def dw(prev, cur, nxt, taps, bias):
        t0, t1, t2 = taps[0:1], taps[1:2], taps[2:3]           # (1, ph) each
        return jnp.maximum(prev * t0 + cur * t1 + nxt * t2 + bias, 0.0)

    o11 = dw(left, o1, right, th_ref[...], bh_ref[...])
    o12 = dw(left, o1, right, thh_ref[...], bhh_ref[...])
    o21 = dw(up, o2, down, tv_ref[...], bv_ref[...])
    o22 = dw(up, o2, down, tvv_ref[...], bvv_ref[...])

    # ---- conv3 (1x1) + folded bn3: sum of four matmuls (no lane-axis concat).
    def mm(a, w_ref):
        return jnp.dot(a.reshape(M, ph).astype(jnp.bfloat16), w_ref[...],
                       preferred_element_type=jnp.float32)

    acc = mm(o11, w3a_ref) + mm(o12, w3b_ref) + mm(o21, w3c_ref) + mm(o22, w3d_ref)
    acc = acc + b3_ref[...]

    # ---- residual add (downsample is None => residual = x) + relu.
    out = jnp.maximum(acc.reshape(Bt, H, W, -1) + x, 0.0)
    o_ref[...] = out.astype(o_ref.dtype)


# ----------------------------------------------------------------------------
# Wrappers.
# ----------------------------------------------------------------------------
def bottleneck_friendly3_nhwc(x_nhwc, folded_params, *, batch_tile=None):
    """Core entry point: NHWC in / NHWC out (no layout transposes)."""
    x = x_nhwc.astype(jnp.float32)
    N, H, W, Cin = x.shape
    Cout = folded_params[-1].shape[-1]
    bt = N if batch_tile is None else batch_tile
    assert N % bt == 0, (N, bt)

    def wspec(a):
        nd = a.ndim
        return pl.BlockSpec(a.shape, lambda n, _nd=nd: (0,) * _nd)

    return pl.pallas_call(
        _bottleneck_kernel,
        out_shape=jax.ShapeDtypeStruct((N, H, W, Cout), jnp.float32),
        grid=(N // bt,),
        in_specs=[pl.BlockSpec((bt, H, W, Cin), lambda n: (n, 0, 0, 0))]
                + [wspec(a) for a in folded_params],
        out_specs=pl.BlockSpec((bt, H, W, Cout), lambda n: (n, 0, 0, 0)),
        compiler_params=pltpu.CompilerParams(
            dimension_semantics=("parallel",),
            vmem_limit_bytes=32 * 1024 * 1024,
        ),
    )(x, *folded_params)


def bottleneck_friendly3(x_nchw, folded_params, *, batch_tile=None):
    """PyTorch-compatible NCHW boundary.  NOTE: the two transposes below are a
    full HBM round-trip each; keep the surrounding model in NHWC if possible."""
    x = jnp.transpose(x_nchw, (0, 2, 3, 1))
    out = bottleneck_friendly3_nhwc(x, folded_params, batch_tile=batch_tile)
    return jnp.transpose(out, (0, 3, 1, 2))


# ----------------------------------------------------------------------------
# Deterministic parameter construction (torch-shaped) + host-side folding.
# ----------------------------------------------------------------------------
def make_raw_params(key, inplanes, planes):
    """Torch-shaped conv weights + BatchNorm (gamma, beta, running mean/var)."""
    expansion = 4
    ph = planes // 2
    keys = iter(jax.random.split(key, 32))   # 30 needed; headroom is harmless

    def conv_w(shape):
        return jax.random.normal(next(keys), shape, jnp.float32) * 0.1

    def bn(c):
        gamma = jax.random.uniform(next(keys), (c,), jnp.float32, 0.5, 1.5)
        beta = jax.random.normal(next(keys), (c,), jnp.float32) * 0.05
        mean = jax.random.normal(next(keys), (c,), jnp.float32) * 0.05
        var = jax.random.uniform(next(keys), (c,), jnp.float32, 0.5, 1.5)
        return (gamma, beta, mean, var)

    return dict(
        conv1=conv_w((planes, inplanes, 1, 1)), bn1=bn(planes),
        conv2_h=conv_w((ph, 1, 1, 3)), bn2_h=bn(ph),
        conv2_hh=conv_w((ph, 1, 1, 3)), bn2_hh=bn(ph),
        conv2_v=conv_w((ph, 1, 3, 1)), bn2_v=bn(ph),
        conv2_vv=conv_w((ph, 1, 3, 1)), bn2_vv=bn(ph),
        conv3=conv_w((planes * expansion, 2 * planes, 1, 1)),
        bn3=bn(planes * expansion),
    )


def _bn_fold(bn_params, eps=1e-5):
    gamma, beta, mean, var = bn_params
    scale = gamma / jnp.sqrt(var + eps)
    bias = beta - mean * scale
    return scale, bias


def fold_params(raw, mxu_dtype=jnp.bfloat16):
    """Fold eval-mode BN scales into the conv weights and pre-split conv1/conv3
    so the kernel never slices or concatenates along the channel (lane) axis."""
    planes = raw["conv1"].shape[0]
    ph = planes // 2
    cexp = raw["conv3"].shape[0]

    s1, b1 = _bn_fold(raw["bn1"])
    w1 = jnp.transpose(raw["conv1"][:, :, 0, 0], (1, 0)) * s1[None, :]   # (Cin, planes)
    w1a = w1[:, :ph].astype(mxu_dtype)
    w1b = w1[:, ph:].astype(mxu_dtype)
    b1a = b1[:ph].reshape(1, ph)
    b1b = b1[ph:].reshape(1, ph)

    def dw_taps(wname, bnname):
        w = raw[wname].reshape(ph, 3)                       # (out_ch, 3) depthwise taps
        s, b = _bn_fold(raw[bnname])
        return jnp.transpose(w, (1, 0)) * s[None, :], b.reshape(1, ph)   # (3, ph), (1, ph)

    th, bh = dw_taps("conv2_h", "bn2_h")
    thh, bhh = dw_taps("conv2_hh", "bn2_hh")
    tv, bv = dw_taps("conv2_v", "bn2_v")
    tvv, bvv = dw_taps("conv2_vv", "bn2_vv")

    s3, b3 = _bn_fold(raw["bn3"])
    w3 = jnp.transpose(raw["conv3"][:, :, 0, 0], (1, 0)) * s3[None, :]   # (2*planes, cexp)
    w3a = w3[0 * ph:1 * ph].astype(mxu_dtype)
    w3b = w3[1 * ph:2 * ph].astype(mxu_dtype)
    w3c = w3[2 * ph:3 * ph].astype(mxu_dtype)
    w3d = w3[3 * ph:4 * ph].astype(mxu_dtype)
    b3 = b3.reshape(1, cexp)

    return (w1a, w1b, b1a, b1b, th, bh, thh, bhh, tv, bv, tvv, bvv,
            w3a, w3b, w3c, w3d, b3)


# ----------------------------------------------------------------------------
# Pure-JAX references.
# ----------------------------------------------------------------------------
def reference_folded(x_nchw, fp):
    """Reference using the SAME folded params as the kernel (matmul operands
    cast to the weight dtype, f32 accumulation)."""
    (w1a, w1b, b1a, b1b, th, bh, thh, bhh, tv, bv, tvv, bvv,
     w3a, w3b, w3c, w3d, b3) = fp
    x = jnp.transpose(x_nchw, (0, 2, 3, 1)).astype(jnp.float32)
    mdt = w1a.dtype

    def pw(a, w):
        return jnp.einsum('nhwc,cp->nhwp', a.astype(mdt), w,
                          preferred_element_type=jnp.float32)

    o1 = jnp.maximum(pw(x, w1a) + b1a.reshape(1, 1, 1, -1), 0.0)
    o2 = jnp.maximum(pw(x, w1b) + b1b.reshape(1, 1, 1, -1), 0.0)

    def dww(z, t, b):
        zp = jnp.pad(z, ((0, 0), (0, 0), (1, 1), (0, 0)))
        y = zp[:, :, :-2, :] * t[0] + zp[:, :, 1:-1, :] * t[1] + zp[:, :, 2:, :] * t[2]
        return jnp.maximum(y + b.reshape(1, 1, 1, -1), 0.0)

    def dwh(z, t, b):
        zp = jnp.pad(z, ((0, 0), (1, 1), (0, 0), (0, 0)))
        y = zp[:, :-2, :, :] * t[0] + zp[:, 1:-1, :, :] * t[1] + zp[:, 2:, :, :] * t[2]
        return jnp.maximum(y + b.reshape(1, 1, 1, -1), 0.0)

    o11 = dww(o1, th, bh); o12 = dww(o1, thh, bhh)
    o21 = dwh(o2, tv, bv); o22 = dwh(o2, tvv, bvv)

    h3 = (pw(o11, w3a) + pw(o12, w3b) + pw(o21, w3c) + pw(o22, w3d)
          + b3.reshape(1, 1, 1, -1))
    out = jnp.maximum(h3 + x, 0.0)
    return jnp.transpose(out, (0, 3, 1, 2))


def reference_module(x_nchw, raw, eps=1e-5):
    """All-f32 mirror of the PyTorch module (eval-mode BatchNorm), unfolded."""
    x = jnp.transpose(x_nchw, (0, 2, 3, 1)).astype(jnp.float32)
    planes = raw["conv1"].shape[0]
    ph = planes // 2

    def bn(z, p):
        gamma, beta, mean, var = p
        return (z - mean) * (gamma / jnp.sqrt(var + eps)) + beta

    w1 = jnp.transpose(raw["conv1"][:, :, 0, 0], (1, 0))
    h = jnp.maximum(bn(jnp.einsum('nhwc,cp->nhwp', x, w1), raw["bn1"]), 0.0)
    o1, o2 = h[..., :ph], h[..., ph:]

    def dww(z, w):                                    # w: (ph, 1, 1, 3)
        t = jnp.transpose(w[:, 0, 0, :], (1, 0))
        zp = jnp.pad(z, ((0, 0), (0, 0), (1, 1), (0, 0)))
        return zp[:, :, :-2, :] * t[0] + zp[:, :, 1:-1, :] * t[1] + zp[:, :, 2:, :] * t[2]

    def dwh(z, w):                                    # w: (ph, 1, 3, 1)
        t = jnp.transpose(w[:, 0, :, 0], (1, 0))
        zp = jnp.pad(z, ((0, 0), (1, 1), (0, 0), (0, 0)))
        return zp[:, :-2, :, :] * t[0] + zp[:, 1:-1, :, :] * t[1] + zp[:, 2:, :, :] * t[2]

    o11 = jnp.maximum(bn(dww(o1, raw["conv2_h"]), raw["bn2_h"]), 0.0)
    o12 = jnp.maximum(bn(dww(o1, raw["conv2_hh"]), raw["bn2_hh"]), 0.0)
    o21 = jnp.maximum(bn(dwh(o2, raw["conv2_v"]), raw["bn2_v"]), 0.0)
    o22 = jnp.maximum(bn(dwh(o2, raw["conv2_vv"]), raw["bn2_vv"]), 0.0)

    cat = jnp.maximum(jnp.concatenate([o11, o12, o21, o22], axis=-1), 0.0)
    w3 = jnp.transpose(raw["conv3"][:, :, 0, 0], (1, 0))
    h3 = bn(jnp.einsum('nhwc,co->nhwo', cat, w3), raw["bn3"])
    out = jnp.maximum(h3 + x, 0.0)
    return jnp.transpose(out, (0, 3, 1, 2))


if __name__ == "__main__":
    # Small shapes consistent with the module: inplanes == planes * expansion
    # so the identity residual (downsample=None, stride=1) is shape-compatible.
    N, planes, H, W = 2, 8, 8, 8
    inplanes = planes * 4                       # 32

    key = jax.random.PRNGKey(0)
    kx, kp = jax.random.split(key)
    x = jax.random.normal(kx, (N, inplanes, H, W), jnp.float32)   # NCHW (torch layout)

    raw = make_raw_params(kp, inplanes, planes)
    fp_bf16 = fold_params(raw, jnp.bfloat16)    # kernel params (bf16 MXU operands)
    fp_f32 = fold_params(raw, jnp.float32)      # for the folding-faithfulness check

    out = jax.block_until_ready(bottleneck_friendly3(x, fp_bf16))
    assert out.shape == (N, planes * 4, H, W), out.shape

    # (a) Pallas kernel matches a pure-JAX reference with identical folded params.
    ref_a = reference_folded(x, fp_bf16)
    err_a = float(jnp.max(jnp.abs(out - ref_a)))
    assert err_a < 2e-3, err_a

    # (b) The BN folding / weight re-layout is faithful to the module (all f32).
    ref_b = reference_folded(x, fp_f32)
    ref_c = reference_module(x, raw)
    err_b = float(jnp.max(jnp.abs(ref_b - ref_c)))
    assert err_b < 1e-4, err_b

    print("KERNEL_OK")
</pallas_src>

<mosaic_0001>
module attributes {stable_mosaic.version = 11 : i64} {
  func.func @_bottleneck_kernel(%arg0: i32, %arg1: memref<2x8x8x32xf32, #tpu.memory_space<vmem>>, %arg2: memref<32x4xbf16, #tpu.memory_space<vmem>>, %arg3: memref<32x4xbf16, #tpu.memory_space<vmem>>, %arg4: memref<1x4xf32, #tpu.memory_space<vmem>>, %arg5: memref<1x4xf32, #tpu.memory_space<vmem>>, %arg6: memref<3x4xf32, #tpu.memory_space<vmem>>, %arg7: memref<1x4xf32, #tpu.memory_space<vmem>>, %arg8: memref<3x4xf32, #tpu.memory_space<vmem>>, %arg9: memref<1x4xf32, #tpu.memory_space<vmem>>, %arg10: memref<3x4xf32, #tpu.memory_space<vmem>>, %arg11: memref<1x4xf32, #tpu.memory_space<vmem>>, %arg12: memref<3x4xf32, #tpu.memory_space<vmem>>, %arg13: memref<1x4xf32, #tpu.memory_space<vmem>>, %arg14: memref<4x32xbf16, #tpu.memory_space<vmem>>, %arg15: memref<4x32xbf16, #tpu.memory_space<vmem>>, %arg16: memref<4x32xbf16, #tpu.memory_space<vmem>>, %arg17: memref<4x32xbf16, #tpu.memory_space<vmem>>, %arg18: memref<1x32xf32, #tpu.memory_space<vmem>>, %arg19: memref<2x8x8x32xf32, #tpu.memory_space<vmem>>) attributes {dimension_semantics = [#tpu.dimension_semantics<parallel>], iteration_bounds = array<i64: 1>, scalar_prefetch = 0 : i64, scratch_operands = 0 : i64, tpu.core_type = #tpu.core_type<tc>, window_params = [{transform_indices = @transform_0, window_bounds = array<i64: 2, 8, 8, 32>}, {pipeline_mode = #tpu.pipeline_mode<synchronous>, transform_indices = @transform_1, window_bounds = array<i64: 32, 4>}, {pipeline_mode = #tpu.pipeline_mode<synchronous>, transform_indices = @transform_2, window_bounds = array<i64: 32, 4>}, {pipeline_mode = #tpu.pipeline_mode<synchronous>, transform_indices = @transform_3, window_bounds = array<i64: 1, 4>}, {pipeline_mode = #tpu.pipeline_mode<synchronous>, transform_indices = @transform_4, window_bounds = array<i64: 1, 4>}, {pipeline_mode = #tpu.pipeline_mode<synchronous>, transform_indices = @transform_5, window_bounds = array<i64: 3, 4>}, {pipeline_mode = #tpu.pipeline_mode<synchronous>, transform_indices = @transform_6, window_bounds = array<i64: 1, 4>}, {pipeline_mode = #tpu.pipeline_mode<synchronous>, transform_indices = @transform_7, window_bounds = array<i64: 3, 4>}, {pipeline_mode = #tpu.pipeline_mode<synchronous>, transform_indices = @transform_8, window_bounds = array<i64: 1, 4>}, {pipeline_mode = #tpu.pipeline_mode<synchronous>, transform_indices = @transform_9, window_bounds = array<i64: 3, 4>}, {pipeline_mode = #tpu.pipeline_mode<synchronous>, transform_indices = @transform_10, window_bounds = array<i64: 1, 4>}, {pipeline_mode = #tpu.pipeline_mode<synchronous>, transform_indices = @transform_11, window_bounds = array<i64: 3, 4>}, {pipeline_mode = #tpu.pipeline_mode<synchronous>, transform_indices = @transform_12, window_bounds = array<i64: 1, 4>}, {pipeline_mode = #tpu.pipeline_mode<synchronous>, transform_indices = @transform_13, window_bounds = array<i64: 4, 32>}, {pipeline_mode = #tpu.pipeline_mode<synchronous>, transform_indices = @transform_14, window_bounds = array<i64: 4, 32>}, {pipeline_mode = #tpu.pipeline_mode<synchronous>, transform_indices = @transform_15, window_bounds = array<i64: 4, 32>}, {pipeline_mode = #tpu.pipeline_mode<synchronous>, transform_indices = @transform_16, window_bounds = array<i64: 4, 32>}, {pipeline_mode = #tpu.pipeline_mode<synchronous>, transform_indices = @transform_17, window_bounds = array<i64: 1, 32>}, {transform_indices = @transform_18, window_bounds = array<i64: 2, 8, 8, 32>}]} {
    %c0 = arith.constant 0 : index
    %c0_0 = arith.constant 0 : index
    %c0_1 = arith.constant 0 : index
    %c0_2 = arith.constant 0 : index
    %0 = vector.load %arg1[%c0, %c0_0, %c0_1, %c0_2] : memref<2x8x8x32xf32, #tpu.memory_space<vmem>>, vector<2x8x8x32xf32>
    %1 = vector.shape_cast %0 : vector<2x8x8x32xf32> to vector<128x32xf32>
    %2 = arith.truncf %1 : vector<128x32xf32> to vector<128x32xbf16>
    %c0_3 = arith.constant 0 : index
    %c0_4 = arith.constant 0 : index
    %3 = vector.load %arg2[%c0_3, %c0_4] : memref<32x4xbf16, #tpu.memory_space<vmem>>, vector<32x4xbf16>
    %cst = arith.constant dense<0.000000e+00> : vector<128x4xf32>
    %4 = tpu.matmul %2, %3, %cst {dimension_numbers = #tpu.dot_dimension_numbers<[1], [0], [0], [1], [0, 0, 1, 1], [], []>} : vector<128x32xbf16>, vector<32x4xbf16>, vector<128x4xf32> -> vector<128x4xf32>
    %c0_5 = arith.constant 0 : index
    %c0_6 = arith.constant 0 : index
    %5 = vector.load %arg4[%c0_5, %c0_6] : memref<1x4xf32, #tpu.memory_space<vmem>>, vector<1x4xf32>
    %6 = vector.broadcast %5 : vector<1x4xf32> to vector<128x4xf32>
    %7 = arith.addf %4, %6 : vector<128x4xf32>
    %cst_7 = arith.constant 0.000000e+00 : f32
    %8 = vector.broadcast %cst_7 : f32 to vector<128x4xf32>
    %9 = arith.maximumf %7, %8 : vector<128x4xf32>
    %10 = vector.shape_cast %9 : vector<128x4xf32> to vector<2x8x8x4xf32>
    %c0_8 = arith.constant 0 : index
    %c0_9 = arith.constant 0 : index
    %11 = vector.load %arg3[%c0_8, %c0_9] : memref<32x4xbf16, #tpu.memory_space<vmem>>, vector<32x4xbf16>
    %cst_10 = arith.constant dense<0.000000e+00> : vector<128x4xf32>
    %12 = tpu.matmul %2, %11, %cst_10 {dimension_numbers = #tpu.dot_dimension_numbers<[1], [0], [0], [1], [0, 0, 1, 1], [], []>} : vector<128x32xbf16>, vector<32x4xbf16>, vector<128x4xf32> -> vector<128x4xf32>
    %c0_11 = arith.constant 0 : index
    %c0_12 = arith.constant 0 : index
    %13 = vector.load %arg5[%c0_11, %c0_12] : memref<1x4xf32, #tpu.memory_space<vmem>>, vector<1x4xf32>
    %14 = vector.broadcast %13 : vector<1x4xf32> to vector<128x4xf32>
    %15 = arith.addf %12, %14 : vector<128x4xf32>
    %cst_13 = arith.constant 0.000000e+00 : f32
    %16 = vector.broadcast %cst_13 : f32 to vector<128x4xf32>
    %17 = arith.maximumf %15, %16 : vector<128x4xf32>
    %18 = vector.shape_cast %17 : vector<128x4xf32> to vector<2x8x8x4xf32>
    %cst_14 = arith.constant 0.000000e+00 : f32
    %19 = vector.broadcast %cst_14 : f32 to vector<2x8x1x4xf32>
    %20 = vector.extract_strided_slice %10 {offsets = [0, 0, 0, 0], sizes = [2, 8, 7, 4], strides = [1, 1, 1, 1]} : vector<2x8x8x4xf32> to vector<2x8x7x4xf32>
    %21 = tpu.concatenate %19, %20 in 2 : vector<2x8x1x4xf32>, vector<2x8x7x4xf32> -> vector<2x8x8x4xf32>
    %22 = vector.extract_strided_slice %10 {offsets = [0, 0, 1, 0], sizes = [2, 8, 7, 4], strides = [1, 1, 1, 1]} : vector<2x8x8x4xf32> to vector<2x8x7x4xf32>
    %23 = tpu.concatenate %22, %19 in 2 : vector<2x8x7x4xf32>, vector<2x8x1x4xf32> -> vector<2x8x8x4xf32>
    %cst_15 = arith.constant 0.000000e+00 : f32
    %24 = vector.broadcast %cst_15 : f32 to vector<2x1x8x4xf32>
    %25 = vector.extract_strided_slice %18 {offsets = [0, 0, 0, 0], sizes = [2, 7, 8, 4], strides = [1, 1, 1, 1]} : vector<2x8x8x4xf32> to vector<2x7x8x4xf32>
    %26 = tpu.concatenate %24, %25 in 1 : vector<2x1x8x4xf32>, vector<2x7x8x4xf32> -> vector<2x8x8x4xf32>
    %27 = vector.extract_strided_slice %18 {offsets = [0, 1, 0, 0], sizes = [2, 7, 8, 4], strides = [1, 1, 1, 1]} : vector<2x8x8x4xf32> to vector<2x7x8x4xf32>
    %28 = tpu.concatenate %27, %24 in 1 : vector<2x7x8x4xf32>, vector<2x1x8x4xf32> -> vector<2x8x8x4xf32>
    %c0_16 = arith.constant 0 : index
    %c0_17 = arith.constant 0 : index
    %29 = vector.load %arg6[%c0_16, %c0_17] : memref<3x4xf32, #tpu.memory_space<vmem>>, vector<3x4xf32>
    %c0_18 = arith.constant 0 : index
    %c0_19 = arith.constant 0 : index
    %30 = vector.load %arg7[%c0_18, %c0_19] : memref<1x4xf32, #tpu.memory_space<vmem>>, vector<1x4xf32>
    %31 = vector.extract_strided_slice %29 {offsets = [0, 0], sizes = [1, 4], strides = [1, 1]} : vector<3x4xf32> to vector<1x4xf32>
    %32 = vector.extract_strided_slice %29 {offsets = [1, 0], sizes = [1, 4], strides = [1, 1]} : vector<3x4xf32> to vector<1x4xf32>
    %33 = vector.extract_strided_slice %29 {offsets = [2, 0], sizes = [1, 4], strides = [1, 1]} : vector<3x4xf32> to vector<1x4xf32>
    %34 = vector.shape_cast %31 : vector<1x4xf32> to vector<1x1x1x4xf32>
    %35 = vector.broadcast %34 : vector<1x1x1x4xf32> to vector<2x8x8x4xf32>
    %36 = arith.mulf %21, %35 : vector<2x8x8x4xf32>
    %37 = vector.shape_cast %32 : vector<1x4xf32> to vector<1x1x1x4xf32>
    %38 = vector.broadcast %37 : vector<1x1x1x4xf32> to vector<2x8x8x4xf32>
    %39 = arith.mulf %10, %38 : vector<2x8x8x4xf32>
    %40 = arith.addf %36, %39 : vector<2x8x8x4xf32>
    %41 = vector.shape_cast %33 : vector<1x4xf32> to vector<1x1x1x4xf32>
    %42 = vector.broadcast %41 : vector<1x1x1x4xf32> to vector<2x8x8x4xf32>
    %43 = arith.mulf %23, %42 : vector<2x8x8x4xf32>
    %44 = arith.addf %40, %43 : vector<2x8x8x4xf32>
    %45 = vector.shape_cast %30 : vector<1x4xf32> to vector<1x1x1x4xf32>
    %46 = vector.broadcast %45 : vector<1x1x1x4xf32> to vector<2x8x8x4xf32>
    %47 = arith.addf %44, %46 : vector<2x8x8x4xf32>
    %cst_20 = arith.constant 0.000000e+00 : f32
    %48 = vector.broadcast %cst_20 : f32 to vector<2x8x8x4xf32>
    %49 = arith.maximumf %47, %48 : vector<2x8x8x4xf32>
    %c0_21 = arith.constant 0 : index
    %c0_22 = arith.constant 0 : index
    %50 = vector.load %arg8[%c0_21, %c0_22] : memref<3x4xf32, #tpu.memory_space<vmem>>, vector<3x4xf32>
    %c0_23 = arith.constant 0 : index
    %c0_24 = arith.constant 0 : index
    %51 = vector.load %arg9[%c0_23, %c0_24] : memref<1x4xf32, #tpu.memory_space<vmem>>, vector<1x4xf32>
    %52 = vector.extract_strided_slice %50 {offsets = [0, 0], sizes = [1, 4], strides = [1, 1]} : vector<3x4xf32> to vector<1x4xf32>
    %53 = vector.extract_strided_slice %50 {offsets = [1, 0], sizes = [1, 4], strides = [1, 1]} : vector<3x4xf32> to vector<1x4xf32>
    %54 = vector.extract_strided_slice %50 {offsets = [2, 0], sizes = [1, 4], strides = [1, 1]} : vector<3x4xf32> to vector<1x4xf32>
    %55 = vector.shape_cast %52 : vector<1x4xf32> to vector<1x1x1x4xf32>
    %56 = vector.broadcast %55 : vector<1x1x1x4xf32> to vector<2x8x8x4xf32>
    %57 = arith.mulf %21, %56 : vector<2x8x8x4xf32>
    %58 = vector.shape_cast %53 : vector<1x4xf32> to vector<1x1x1x4xf32>
    %59 = vector.broadcast %58 : vector<1x1x1x4xf32> to vector<2x8x8x4xf32>
    %60 = arith.mulf %10, %59 : vector<2x8x8x4xf32>
    %61 = arith.addf %57, %60 : vector<2x8x8x4xf32>
    %62 = vector.shape_cast %54 : vector<1x4xf32> to vector<1x1x1x4xf32>
    %63 = vector.broadcast %62 : vector<1x1x1x4xf32> to vector<2x8x8x4xf32>
    %64 = arith.mulf %23, %63 : vector<2x8x8x4xf32>
    %65 = arith.addf %61, %64 : vector<2x8x8x4xf32>
    %66 = vector.shape_cast %51 : vector<1x4xf32> to vector<1x1x1x4xf32>
    %67 = vector.broadcast %66 : vector<1x1x1x4xf32> to vector<2x8x8x4xf32>
    %68 = arith.addf %65, %67 : vector<2x8x8x4xf32>
    %cst_25 = arith.constant 0.000000e+00 : f32
    %69 = vector.broadcast %cst_25 : f32 to vector<2x8x8x4xf32>
    %70 = arith.maximumf %68, %69 : vector<2x8x8x4xf32>
    %c0_26 = arith.constant 0 : index
    %c0_27 = arith.constant 0 : index
    %71 = vector.load %arg10[%c0_26, %c0_27] : memref<3x4xf32, #tpu.memory_space<vmem>>, vector<3x4xf32>
    %c0_28 = arith.constant 0 : index
    %c0_29 = arith.constant 0 : index
    %72 = vector.load %arg11[%c0_28, %c0_29] : memref<1x4xf32, #tpu.memory_space<vmem>>, vector<1x4xf32>
    %73 = vector.extract_strided_slice %71 {offsets = [0, 0], sizes = [1, 4], strides = [1, 1]} : vector<3x4xf32> to vector<1x4xf32>
    %74 = vector.extract_strided_slice %71 {offsets = [1, 0], sizes = [1, 4], strides = [1, 1]} : vector<3x4xf32> to vector<1x4xf32>
    %75 = vector.extract_strided_slice %71 {offsets = [2, 0], sizes = [1, 4], strides = [1, 1]} : vector<3x4xf32> to vector<1x4xf32>
    %76 = vector.shape_cast %73 : vector<1x4xf32> to vector<1x1x1x4xf32>
    %77 = vector.broadcast %76 : vector<1x1x1x4xf32> to vector<2x8x8x4xf32>
    %78 = arith.mulf %26, %77 : vector<2x8x8x4xf32>
    %79 = vector.shape_cast %74 : vector<1x4xf32> to vector<1x1x1x4xf32>
    %80 = vector.broadcast %79 : vector<1x1x1x4xf32> to vector<2x8x8x4xf32>
    %81 = arith.mulf %18, %80 : vector<2x8x8x4xf32>
    %82 = arith.addf %78, %81 : vector<2x8x8x4xf32>
    %83 = vector.shape_cast %75 : vector<1x4xf32> to vector<1x1x1x4xf32>
    %84 = vector.broadcast %83 : vector<1x1x1x4xf32> to vector<2x8x8x4xf32>
    %85 = arith.mulf %28, %84 : vector<2x8x8x4xf32>
    %86 = arith.addf %82, %85 : vector<2x8x8x4xf32>
    %87 = vector.shape_cast %72 : vector<1x4xf32> to vector<1x1x1x4xf32>
    %88 = vector.broadcast %87 : vector<1x1x1x4xf32> to vector<2x8x8x4xf32>
    %89 = arith.addf %86, %88 : vector<2x8x8x4xf32>
    %cst_30 = arith.constant 0.000000e+00 : f32
    %90 = vector.broadcast %cst_30 : f32 to vector<2x8x8x4xf32>
    %91 = arith.maximumf %89, %90 : vector<2x8x8x4xf32>
    %c0_31 = arith.constant 0 : index
    %c0_32 = arith.constant 0 : index
    %92 = vector.load %arg12[%c0_31, %c0_32] : memref<3x4xf32, #tpu.memory_space<vmem>>, vector<3x4xf32>
    %c0_33 = arith.constant 0 : index
    %c0_34 = arith.constant 0 : index
    %93 = vector.load %arg13[%c0_33, %c0_34] : memref<1x4xf32, #tpu.memory_space<vmem>>, vector<1x4xf32>
    %94 = vector.extract_strided_slice %92 {offsets = [0, 0], sizes = [1, 4], strides = [1, 1]} : vector<3x4xf32> to vector<1x4xf32>
    %95 = vector.extract_strided_slice %92 {offsets = [1, 0], sizes = [1, 4], strides = [1, 1]} : vector<3x4xf32> to vector<1x4xf32>
    %96 = vector.extract_strided_slice %92 {offsets = [2, 0], sizes = [1, 4], strides = [1, 1]} : vector<3x4xf32> to vector<1x4xf32>
    %97 = vector.shape_cast %94 : vector<1x4xf32> to vector<1x1x1x4xf32>
    %98 = vector.broadcast %97 : vector<1x1x1x4xf32> to vector<2x8x8x4xf32>
    %99 = arith.mulf %26, %98 : vector<2x8x8x4xf32>
    %100 = vector.shape_cast %95 : vector<1x4xf32> to vector<1x1x1x4xf32>
    %101 = vector.broadcast %100 : vector<1x1x1x4xf32> to vector<2x8x8x4xf32>
    %102 = arith.mulf %18, %101 : vector<2x8x8x4xf32>
    %103 = arith.addf %99, %102 : vector<2x8x8x4xf32>
    %104 = vector.shape_cast %96 : vector<1x4xf32> to vector<1x1x1x4xf32>
    %105 = vector.broadcast %104 : vector<1x1x1x4xf32> to vector<2x8x8x4xf32>
    %106 = arith.mulf %28, %105 : vector<2x8x8x4xf32>
    %107 = arith.addf %103, %106 : vector<2x8x8x4xf32>
    %108 = vector.shape_cast %93 : vector<1x4xf32> to vector<1x1x1x4xf32>
    %109 = vector.broadcast %108 : vector<1x1x1x4xf32> to vector<2x8x8x4xf32>
    %110 = arith.addf %107, %109 : vector<2x8x8x4xf32>
    %cst_35 = arith.constant 0.000000e+00 : f32
    %111 = vector.broadcast %cst_35 : f32 to vector<2x8x8x4xf32>
    %112 = arith.maximumf %110, %111 : vector<2x8x8x4xf32>
    %113 = vector.shape_cast %49 : vector<2x8x8x4xf32> to vector<128x4xf32>
    %114 = arith.truncf %113 : vector<128x4xf32> to vector<128x4xbf16>
    %c0_36 = arith.constant 0 : index
    %c0_37 = arith.constant 0 : index
    %115 = vector.load %arg14[%c0_36, %c0_37] : memref<4x32xbf16, #tpu.memory_space<vmem>>, vector<4x32xbf16>
    %cst_38 = arith.constant dense<0.000000e+00> : vector<128x32xf32>
    %116 = tpu.matmul %114, %115, %cst_38 {dimension_numbers = #tpu.dot_dimension_numbers<[1], [0], [0], [1], [0, 0, 1, 1], [], []>} : vector<128x4xbf16>, vector<4x32xbf16>, vector<128x32xf32> -> vector<128x32xf32>
    %117 = vector.shape_cast %70 : vector<2x8x8x4xf32> to vector<128x4xf32>
    %118 = arith.truncf %117 : vector<128x4xf32> to vector<128x4xbf16>
    %c0_39 = arith.constant 0 : index
    %c0_40 = arith.constant 0 : index
    %119 = vector.load %arg15[%c0_39, %c0_40] : memref<4x32xbf16, #tpu.memory_space<vmem>>, vector<4x32xbf16>
    %cst_41 = arith.constant dense<0.000000e+00> : vector<128x32xf32>
    %120 = tpu.matmul %118, %119, %cst_41 {dimension_numbers = #tpu.dot_dimension_numbers<[1], [0], [0], [1], [0, 0, 1, 1], [], []>} : vector<128x4xbf16>, vector<4x32xbf16>, vector<128x32xf32> -> vector<128x32xf32>
    %121 = arith.addf %116, %120 : vector<128x32xf32>
    %122 = vector.shape_cast %91 : vector<2x8x8x4xf32> to vector<128x4xf32>
    %123 = arith.truncf %122 : vector<128x4xf32> to vector<128x4xbf16>
    %c0_42 = arith.constant 0 : index
    %c0_43 = arith.constant 0 : index
    %124 = vector.load %arg16[%c0_42, %c0_43] : memref<4x32xbf16, #tpu.memory_space<vmem>>, vector<4x32xbf16>
    %cst_44 = arith.constant dense<0.000000e+00> : vector<128x32xf32>
    %125 = tpu.matmul %123, %124, %cst_44 {dimension_numbers = #tpu.dot_dimension_numbers<[1], [0], [0], [1], [0, 0, 1, 1], [], []>} : vector<128x4xbf16>, vector<4x32xbf16>, vector<128x32xf32> -> vector<128x32xf32>
    %126 = arith.addf %121, %125 : vector<128x32xf32>
    %127 = vector.shape_cast %112 : vector<2x8x8x4xf32> to vector<128x4xf32>
    %128 = arith.truncf %127 : vector<128x4xf32> to vector<128x4xbf16>
    %c0_45 = arith.constant 0 : index
    %c0_46 = arith.constant 0 : index
    %129 = vector.load %arg17[%c0_45, %c0_46] : memref<4x32xbf16, #tpu.memory_space<vmem>>, vector<4x32xbf16>
    %cst_47 = arith.constant dense<0.000000e+00> : vector<128x32xf32>
    %130 = tpu.matmul %128, %129, %cst_47 {dimension_numbers = #tpu.dot_dimension_numbers<[1], [0], [0], [1], [0, 0, 1, 1], [], []>} : vector<128x4xbf16>, vector<4x32xbf16>, vector<128x32xf32> -> vector<128x32xf32>
    %131 = arith.addf %126, %130 : vector<128x32xf32>
    %c0_48 = arith.constant 0 : index
    %c0_49 = arith.constant 0 : index
    %132 = vector.load %arg18[%c0_48, %c0_49] : memref<1x32xf32, #tpu.memory_space<vmem>>, vector<1x32xf32>
    %133 = vector.broadcast %132 : vector<1x32xf32> to vector<128x32xf32>
    %134 = arith.addf %131, %133 : vector<128x32xf32>
    %135 = vector.shape_cast %134 : vector<128x32xf32> to vector<2x8x8x32xf32>
    %136 = arith.addf %135, %0 : vector<2x8x8x32xf32>
    %cst_50 = arith.constant 0.000000e+00 : f32
    %137 = vector.broadcast %cst_50 : f32 to vector<2x8x8x32xf32>
    %138 = arith.maximumf %136, %137 : vector<2x8x8x32xf32>
    %c0_51 = arith.constant 0 : index
    %c0_52 = arith.constant 0 : index
    %c0_53 = arith.constant 0 : index
    %c0_54 = arith.constant 0 : index
    %139 = vector.load %arg19[%c0_51, %c0_52, %c0_53, %c0_54] : memref<2x8x8x32xf32, #tpu.memory_space<vmem>>, vector<2x8x8x32xf32>
    tpu.vector_store %arg19[%c0_51, %c0_52, %c0_53, %c0_54], %138 {strides = array<i32>} : memref<2x8x8x32xf32, #tpu.memory_space<vmem>>, vector<2x8x8x32xf32>,
    return
  }
  func.func @transform_0(%arg0: i32) -> (i32, i32, i32, i32) {
    %c0_i32 = arith.constant 0 : i32
    %c0_i32_0 = arith.constant 0 : i32
    %c0_i32_1 = arith.constant 0 : i32
    %c0_i32_2 = arith.constant 0 : i32
    return %arg0, %c0_i32, %c0_i32_0, %c0_i32_1 : i32, i32, i32, i32
  }
  func.func @transform_1(%arg0: i32) -> (i32, i32) {
    %c0_i32 = arith.constant 0 : i32
    %c0_i32_0 = arith.constant 0 : i32
    %c0_i32_1 = arith.constant 0 : i32
    return %c0_i32, %c0_i32_0 : i32, i32
  }
  func.func @transform_2(%arg0: i32) -> (i32, i32) {
    %c0_i32 = arith.constant 0 : i32
    %c0_i32_0 = arith.constant 0 : i32
    %c0_i32_1 = arith.constant 0 : i32
    return %c0_i32, %c0_i32_0 : i32, i32
  }
  func.func @transform_3(%arg0: i32) -> (i32, i32) {
    %c0_i32 = arith.constant 0 : i32
    %c0_i32_0 = arith.constant 0 : i32
    %c0_i32_1 = arith.constant 0 : i32
    return %c0_i32, %c0_i32_0 : i32, i32
  }
  func.func @transform_4(%arg0: i32) -> (i32, i32) {
    %c0_i32 = arith.constant 0 : i32
    %c0_i32_0 = arith.constant 0 : i32
    %c0_i32_1 = arith.constant 0 : i32
    return %c0_i32, %c0_i32_0 : i32, i32
  }
  func.func @transform_5(%arg0: i32) -> (i32, i32) {
    %c0_i32 = arith.constant 0 : i32
    %c0_i32_0 = arith.constant 0 : i32
    %c0_i32_1 = arith.constant 0 : i32
    return %c0_i32, %c0_i32_0 : i32, i32
  }
  func.func @transform_6(%arg0: i32) -> (i32, i32) {
    %c0_i32 = arith.constant 0 : i32
    %c0_i32_0 = arith.constant 0 : i32
    %c0_i32_1 = arith.constant 0 : i32
    return %c0_i32, %c0_i32_0 : i32, i32
  }
  func.func @transform_7(%arg0: i32) -> (i32, i32) {
    %c0_i32 = arith.constant 0 : i32
    %c0_i32_0 = arith.constant 0 : i32
    %c0_i32_1 = arith.constant 0 : i32
    return %c0_i32, %c0_i32_0 : i32, i32
  }
  func.func @transform_8(%arg0: i32) -> (i32, i32) {
    %c0_i32 = arith.constant 0 : i32
    %c0_i32_0 = arith.constant 0 : i32
    %c0_i32_1 = arith.constant 0 : i32
    return %c0_i32, %c0_i32_0 : i32, i32
  }
  func.func @transform_9(%arg0: i32) -> (i32, i32) {
    %c0_i32 = arith.constant 0 : i32
    %c0_i32_0 = arith.constant 0 : i32
    %c0_i32_1 = arith.constant 0 : i32
    return %c0_i32, %c0_i32_0 : i32, i32
  }
  func.func @transform_10(%arg0: i32) -> (i32, i32) {
    %c0_i32 = arith.constant 0 : i32
    %c0_i32_0 = arith.constant 0 : i32
    %c0_i32_1 = arith.constant 0 : i32
    return %c0_i32, %c0_i32_0 : i32, i32
  }
  func.func @transform_11(%arg0: i32) -> (i32, i32) {
    %c0_i32 = arith.constant 0 : i32
    %c0_i32_0 = arith.constant 0 : i32
    %c0_i32_1 = arith.constant 0 : i32
    return %c0_i32, %c0_i32_0 : i32, i32
  }
  func.func @transform_12(%arg0: i32) -> (i32, i32) {
    %c0_i32 = arith.constant 0 : i32
    %c0_i32_0 = arith.constant 0 : i32
    %c0_i32_1 = arith.constant 0 : i32
    return %c0_i32, %c0_i32_0 : i32, i32
  }
  func.func @transform_13(%arg0: i32) -> (i32, i32) {
    %c0_i32 = arith.constant 0 : i32
    %c0_i32_0 = arith.constant 0 : i32
    %c0_i32_1 = arith.constant 0 : i32
    return %c0_i32, %c0_i32_0 : i32, i32
  }
  func.func @transform_14(%arg0: i32) -> (i32, i32) {
    %c0_i32 = arith.constant 0 : i32
    %c0_i32_0 = arith.constant 0 : i32
    %c0_i32_1 = arith.constant 0 : i32
    return %c0_i32, %c0_i32_0 : i32, i32
  }
  func.func @transform_15(%arg0: i32) -> (i32, i32) {
    %c0_i32 = arith.constant 0 : i32
    %c0_i32_0 = arith.constant 0 : i32
    %c0_i32_1 = arith.constant 0 : i32
    return %c0_i32, %c0_i32_0 : i32, i32
  }
  func.func @transform_16(%arg0: i32) -> (i32, i32) {
    %c0_i32 = arith.constant 0 : i32
    %c0_i32_0 = arith.constant 0 : i32
    %c0_i32_1 = arith.constant 0 : i32
    return %c0_i32, %c0_i32_0 : i32, i32
  }
  func.func @transform_17(%arg0: i32) -> (i32, i32) {
    %c0_i32 = arith.constant 0 : i32
    %c0_i32_0 = arith.constant 0 : i32
    %c0_i32_1 = arith.constant 0 : i32
    return %c0_i32, %c0_i32_0 : i32, i32
  }
  func.func @transform_18(%arg0: i32) -> (i32, i32, i32, i32) {
    %c0_i32 = arith.constant 0 : i32
    %c0_i32_0 = arith.constant 0 : i32
    %c0_i32_1 = arith.constant 0 : i32
    %c0_i32_2 = arith.constant 0 : i32
    return %arg0, %c0_i32, %c0_i32_0, %c0_i32_1 : i32, i32, i32, i32
  }
}

</mosaic_0001>

<bundles_post_ra>
// kernel: tpu_custom_call.1
= control target key start
LH: loop header
LB: loop body
LE: loop exit
PB: predicated region body
PF: predicated region fallthrough
CT: control target
= control target key end

     0   :  { %s3126_s0 = inlined_call_operand.hbm [shape: f32[2,8,8,32], index: 0, kind: input, shape index: {}]   ;;  %s3127_s1 = inlined_call_operand.vmem [shape: bf16[32,4], index: 1, kind: input, shape index: {}]   ;;  %s3128_s2 = inlined_call_operand.vmem [shape: bf16[32,4], index: 2, kind: input, shape index: {}]   ;;  %s3129_s3 = inlined_call_operand.vmem [shape: f32[1,4], index: 3, kind: input, shape index: {}]   ;;  %s3130_s4 = inlined_call_operand.vmem [shape: f32[1,4], index: 4, kind: input, shape index: {}]   ;;  %s3131_s5 = inlined_call_operand.vmem [shape: f32[3,4], index: 5, kind: input, shape index: {}]   ;;  %s3132_s6 = inlined_call_operand.vmem [shape: f32[1,4], index: 6, kind: input, shape index: {}]   ;;  %s3133_s7 = inlined_call_operand.vmem [shape: f32[3,4], index: 7, kind: input, shape index: {}]   ;;  %s3134_s8 = inlined_call_operand.vmem [shape: f32[1,4], index: 8, kind: input, shape index: {}]   ;;  %s3135_s9 = inlined_call_operand.vmem [shape: f32[3,4], index: 9, kind: input, shape index: {}]   ;;  %s3136_s10 = inlined_call_operand.vmem [shape: f32[1,4], index: 10, kind: input, shape index: {}]   ;;  %s3137_s11 = inlined_call_operand.vmem [shape: f32[3,4], index: 11, kind: input, shape index: {}]   ;;  %s3138_s12 = inlined_call_operand.vmem [shape: f32[1,4], index: 12, kind: input, shape index: {}]   ;;  %s3139_s13 = inlined_call_operand.vmem [shape: bf16[4,32], index: 13, kind: input, shape index: {}]   ;;  %s3140_s14 = inlined_call_operand.vmem [shape: bf16[4,32], index: 14, kind: input, shape index: {}]   ;;  %s3141_s15 = inlined_call_operand.vmem [shape: bf16[4,32], index: 15, kind: input, shape index: {}]   ;;  %s3142_s16 = inlined_call_operand.vmem [shape: bf16[4,32], index: 16, kind: input, shape index: {}]   ;;  %s3143_s17 = inlined_call_operand.vmem [shape: f32[1,32], index: 17, kind: input, shape index: {}]   ;;  %s3144_s18 = inlined_call_operand.hbm [shape: f32[2,8,8,32], index: 18, kind: output, shape index: {}]  }
   0x1   :  { %3160 = sst [smem:[#allocation37_spill]] %s3126_s0 }
   0x2   :  { %3161 = sst [smem:[#allocation38_spill]] %s3127_s1 }
   0x3   :  { %3162 = sst [smem:[#allocation39_spill]] %s3128_s2 }
   0x4   :  { %23 = vsyncpa [#allocation3], 0 }
   0x5   :  { %24 = vsyncpa [#allocation4], 0  ;;  %s2039_s27 = smov [#allocation2]   ;;  %s3163_s0 = sld [smem:[#allocation37_spill]] }
   0x6   :  { %s30_s28 = sshll.u32 %s2039_s27, 4  ;;  %s31_s28 = int_to_ptr.vmem [resolvable:$true] %s30_s28 }
   0xb   :  { %s1991_s19 = scalar_lea.hbm %s3163_s0, 2048 }
   0xc   :  { %p1992_p0 = scmp.ne.s32.totalorder %s3163_s0, %s1991_s19  ;;  %p1995_p1 = scmp.lt.u32.totalorder %s1991_s19, %s3163_s0 }
   0xe   :  { %p1997_p2 = pnand %p1995_p1, %p1992_p0 }
  0x10   :  { %2000 = shalt.err (!%p1997_p2)
}
  0x11   :  { %s2001_s2 = scalar_lea.vmem %s31_s28, 2048  ;;  %p2006_p4 = scmp.lt.s32.totalorder %s31_s28, %s31_s28 }
  0x12   :  { %p2002_p3 = scmp.ne.s32.totalorder %s31_s28, %s2001_s2  ;;  %p2007_p5 = scmp.lt.s32.totalorder %s2001_s2, %s2001_s2 }
  0x14   :  { %p2008_p6 = por %p2007_p5, %p2006_p4 }
  0x16   :  { %p2009_p7 = pnand %p2008_p6, %p2002_p3 }
  0x18   :  { %2012 = shalt.err (!%p2009_p7)
}
  0x19   :  { %s2040_s23 = smov 128   ;;  %s2041_s24 = smov 8  }
  0x1a   :  { %36 = dma.hbm_to_vmem [thread:$0]  %s3163_s0, 2048, %s31_s28, [#allocation3], %s2040_s23, %s2040_s23, %s2041_s24  }
  0x1b   :  { %2035 = dma.done.wait [#allocation3], 2048  }
  0x1c   :  { %2036 = vsyncadd [#allocation3], 4294965248  ;;  %s3164_s30 = sld [smem:[#allocation38_spill]]  ;;  %v75_v2 = vld [vmem:[#allocation2] sm:$0xff]  ;;  %v76_v3 = vld [vmem:[#allocation2 + $0x8] sm:$0xff]  ;;  %vm122_vm0 = vcmask 261120   ;;  %v512_v33 = vlaneseq }
  0x1d   :  { %v77_v4 = vld [vmem:[#allocation2 + $0x10] sm:$0xff]  ;;  %v91_v5 = vpack.c.bf16 %v76_v3, %v75_v2  ;;  %v78_v6 = vld [vmem:[#allocation2 + $0x18] sm:$0xff]  ;;  %s3165_s20 = sld [smem:[#allocation39_spill]]  ;;  %v79_v8 = vld [vmem:[#allocation2 + $0x20] sm:$0xff]  ;;  %vm1077_vm1 = vcmask 1041408   ;;  %vm444_vm2 = vcmask 1040384  }
  0x1e   :  { %v80_v9 = vld [vmem:[#allocation2 + $0x28] sm:$0xff]  ;;  %v92_v10 = vpack.c.bf16 %v78_v6, %v77_v4  ;;  %v81_v13 = vld [vmem:[#allocation2 + $0x30] sm:$0xff]  ;;  %v82_v14 = vld [vmem:[#allocation2 + $0x38] sm:$0xff]  ;;  %v513_v34 = vshrl.u32 %v512_v33, 7  ;;  %vm493_vm3 = vcmask 1046528   ;;  %vm1052_vm4 = vcmask 31744  }
  0x1f   :  { %1807 = vmatprep.mubr.msk.bf16.mxu1 %vm122_vm0, %v91_v5  ;;  %v93_v11 = vpack.c.bf16 %v80_v9, %v79_v8  ;;  %v83_v15 = vld [vmem:[#allocation2 + $0x40] sm:$0xff]  ;;  %v84_v16 = vld [vmem:[#allocation2 + $0x48] sm:$0xff]  ;;  %v94_v17 = vpack.c.bf16 %v82_v14, %v81_v13  ;;  %v85_v19 = vld [vmem:[#allocation2 + $0x50] sm:$0xff] }
  0x20   :  { %v95_v18 = vpack.c.bf16 %v84_v16, %v83_v15  ;;  %v86_v20 = vld [vmem:[#allocation2 + $0x58] sm:$0xff]  ;;  %v87_v21 = vld [vmem:[#allocation2 + $0x60] sm:$0xff]  ;;  %v88_v22 = vld [vmem:[#allocation2 + $0x68] sm:$0xff]  ;;  %v534_v36 = vsub.s32 1, %v513_v34  ;;  %v514_v38 = vsub.s32 0, %v513_v34  ;;  %v570_v39 = vsub.s32 2, %v513_v34 }
  0x21   :  { %v96_v23 = vpack.c.bf16 %v86_v20, %v85_v19  ;;  %v97_v24 = vpack.c.bf16 %v88_v22, %v87_v21  ;;  %v89_v25 = vld [vmem:[#allocation2 + $0x70] sm:$0xff]  ;;  %v90_v26 = vld [vmem:[#allocation2 + $0x78] sm:$0xff]  ;;  %v1051_v28 = vld [vmem:[%s3140_s14] sm:$0x3] }
  0x22   :  { %v1971_v0 = vld [vmem:[%s3164_s30] sm:$0xff]   ;;  %v1972_v1 = vld [vmem:[%s3164_s30 + $0x8] sm:$0xff]   ;;  %v98_v27 = vpack.c.bf16 %v90_v26, %v89_v25  ;;  %v1079_v30 = vsel %vm1077_vm1, %v1051_v28, 0 }
  0x23   :  { %1803 = vmatprep.subr.bf16.mxu1 %v1971_v0  ;;  %v1973_v7 = vld [vmem:[%s3165_s20] sm:$0xff]   ;;  %v1974_v12 = vld [vmem:[%s3165_s20 + $0x8] sm:$0xff]  }
  0x24   :  { %1804 = vmatpush3.bf16.msra.mxu1 %v1971_v0  ;;  %v1042_v29 = vld [vmem:[%s3139_s13] sm:$0x3] }
  0x25   :  { %1805 = vmatprep.subr.bf16.mxu1 %v1972_v1  ;;  %1964 = vmatprep.subr.msk.bf16.mxu0 %vm1077_vm1, %v1042_v29  ;;  %v1203_v31 = vsel %vm1077_vm1, %v1042_v29, 0  ;;  %v1310_v32 = vld [vmem:[%s3141_s15] sm:$0x3] }
  0x26   :  { %1862 = vmatpush3.bf16.msra.mxu0 %v1203_v31  ;;  %v510_v35 = vld [vmem:[%s3131_s5] sm:$0x7]  ;;  %v2230_v54 = vsel %vm1077_vm1, %v1310_v32, 0 }
  0x27   :  { %1965 = vmatprep.subr.msk.bf16.mxu0 %vm1077_vm1, %v1310_v32  ;;  %v774_v37 = vld [vmem:[%s3135_s9] sm:$0x7]  ;;  %v2214_v44 = vrot.slane %v510_v35, %v534_v36  ;;  %v2220_v48 = vrot.slane %v510_v35, %v514_v38  ;;  %v2222_v49 = vrot.slane %v510_v35, %v570_v39 }
  0x28   :  { %1806 = vmatpush3.bf16.msra.mxu1 %v1972_v1  ;;  %v642_v40 = vld [vmem:[%s3133_s7] sm:$0x7]  ;;  %v2212_v43 = vrot.slane %v774_v37, %v514_v38  ;;  %v2238_v58 = vrot.slane %v774_v37, %v534_v36  ;;  %v2249_v1 = vrot.slane %v774_v37, %v570_v39 }
  0x29   :  { %1823 = vmatprep.subr.bf16.mxu1 %v1973_v7  ;;  %v904_v41 = vld [vmem:[%s3137_s11] sm:$0x7]  ;;  %v2216_v45 = vrot.slane %v642_v40, %v534_v36  ;;  %v2225_v51 = vrot.slane %v642_v40, %v514_v38  ;;  %v2227_v52 = vrot.slane %v642_v40, %v570_v39 }
  0x2a   :  { %v2210_v42 = vld [vmem:[%s3129_s3] ss:$0 sm:$0xff]  ;;  %3166 = vst [vmem:[#allocation8_spill] sm:$0xff] %v2212_v43  ;;  %v2218_v46 = vrot.slane %v904_v41, %v514_v38  ;;  %3168 = vst [vmem:[#allocation10_spill] sm:$0xff] %v2238_v58  ;;  %v2240_v59 = vrot.slane %v904_v41, %v534_v36  ;;  %v2243_v60 = vmul.f32 0.0, %v2212_v43  ;;  %v2252_v4 = vrot.slane %v904_v41, %v570_v39 }
  0x2b   :  { %1808 = vmatmul.mubr.msk.bf16.vlgmr.msra.gmra.mrb[0].mxu1 %vm122_vm0, %v92_v10  ;;  %v2235_v55 = vld [vmem:[%s3142_s16] sm:$0x3]  ;;  %3172 = vst [vmem:[#allocation14_spill] sm:$0xff] %v2249_v1  ;;  %v2260_v9 = vmul.f32 0.0, %v2249_v1 }
  0x2c   :  { %1824 = vmatpush3.bf16.msra.mxu1 %v1973_v7  ;;  %1811 = vmatprep.mubr.msk.bf16.mxu1 %vm122_vm0, %v93_v11  ;;  %3167 = vst [vmem:[#allocation9_spill] sm:$0xff] %v2218_v46  ;;  %3169 = vst [vmem:[#allocation11_spill] sm:$0xff] %v2240_v59  ;;  %v2247_v0 = vmul.f32 0.0, %v2218_v46  ;;  %v2288_v33 = vld [vmem:[%s3134_s8] ss:$0 sm:$0xff] }
  0x2d   :  { %1825 = vmatprep.subr.bf16.mxu1 %v1974_v12  ;;  %3170 = vst [vmem:[#allocation12_spill] sm:$0xff] %v2243_v60  ;;  %3173 = vst [vmem:[#allocation15_spill] sm:$0xff] %v2252_v4 }
  0x2e   :  { %3171 = vst [vmem:[#allocation13_spill] sm:$0xff] %v2247_v0  ;;  %3175 = vst [vmem:[#allocation17_spill] sm:$0xff] %v2260_v9 }
  0x30   :  { %1826 = vmatpush3.bf16.msra.mxu1 %v1974_v12 }
  0x31   :  { %1963 = vmatprep.subr.msk.bf16.mxu1 %vm1077_vm1, %v1051_v28 }
  0x33   :  { %1812 = vmatmul.mubr.msk.bf16.gmra.mrb[4].mxu1 %vm122_vm0, %v94_v17 }
  0x34   :  { %1815 = vmatprep.mubr.msk.bf16.mxu1 %vm122_vm0, %v95_v18 }
  0x3b   :  { %1816 = vmatmul.mubr.msk.bf16.gmra.mrb[8].mxu1 %vm122_vm0, %v96_v23 }
  0x3c   :  { %1819 = vmatprep.mubr.msk.bf16.mxu1 %vm122_vm0, %v97_v24 }
  0x43   :  { %1820 = vmatmul.mubr.msk.bf16.gmra.mrb[12].mxu1 %vm122_vm0, %v98_v27 }
  0x44   :  { %1827 = vmatprep.mubr.msk.bf16.mxu1 %vm122_vm0, %v91_v5  ;;  %v2256_v5 = vsel %vm1077_vm1, %v2235_v55, 0 }
  0x45   :  { %3174 = vst [vmem:[#allocation16_spill] sm:$0xff] %v2256_v5 }
  0x4b   :  { %1828 = vmatmul.mubr.msk.bf16.vlgmr.msra.gmra.mrb[16].mxu1 %vm122_vm0, %v92_v10 }
  0x4c   :  { %1831 = vmatprep.mubr.msk.bf16.mxu1 %vm122_vm0, %v93_v11  ;;  %1844 = vmatpush3.bf16.msra.mxu1 %v1079_v30 }
  0x53   :  { %1832 = vmatmul.mubr.msk.bf16.gmra.mrb[20].mxu1 %vm122_vm0, %v94_v17 }
  0x54   :  { %1835 = vmatprep.mubr.msk.bf16.mxu1 %vm122_vm0, %v95_v18 }
  0x5b   :  { %1836 = vmatmul.mubr.msk.bf16.gmra.mrb[24].mxu1 %vm122_vm0, %v96_v23 }
  0x5c   :  { %1839 = vmatprep.mubr.msk.bf16.mxu1 %vm122_vm0, %v97_v24 }
  0x63   :  { %1840 = vmatmul.mubr.msk.bf16.gmra.mrb[28].mxu1 %vm122_vm0, %v98_v27 }
  0xfe   :  { %v1809_v47 = vpop.f32.mrb[0].mxu1 }
  0xff   :  { %v190_v50 = vadd.f32 %v1809_v47, %v2210_v42  ;;  %v181_v53 = vpop.f32.mrb[1].mxu1 }
 0x100   :  { %v182_v56 = vadd.f32 %v2210_v42, %v181_v53  ;;  %v1810_v57 = vpop.f32.mrb[2].mxu1 }
 0x101   :  { %v246_v61 = vmax.f32 %v190_v50, 0.0  ;;  %v193_v62 = vadd.f32 %v1810_v57, %v2210_v42  ;;  %v184_v63 = vpop.f32.mrb[3].mxu1 }
 0x102   :  { %v244_v2 = vmax.f32 %v182_v56, 0.0  ;;  %v185_v3 = vadd.f32 %v2210_v42, %v184_v63 }
 0x103   :  { %v414_v6 = vrot.slane %v246_v61, 7  ;;  %v463_v7 = vrot.slane %v246_v61, 1  ;;  %v538_v8 = vmul.f32 %v2214_v44, %v246_v61  ;;  %v670_v10 = vmul.f32 %v2216_v45, %v246_v61 }
 0x104   :  { %v412_v11 = vrot.slane %v244_v2, 7  ;;  %v461_v12 = vrot.slane %v244_v2, 1  ;;  %v2264_v13 = vmul.f32 %v2214_v44, %v244_v2  ;;  %v668_v16 = vmul.f32 %v2216_v45, %v244_v2 }
 0x105   :  { %v447_v14 = vsel %vm444_vm2, 0.0, %v414_v6  ;;  %v496_v15 = vsel %vm493_vm3, %v463_v7, 0.0  ;;  %v247_v17 = vmax.f32 %v193_v62, 0.0  ;;  %v245_v21 = vmax.f32 %v185_v3, 0.0 }
 0x106   :  { %v518_v18 = vmul.f32 %v2220_v48, %v447_v14  ;;  %v2271_v19 = vmul.f32 %v2222_v49, %v496_v15  ;;  %v650_v20 = vmul.f32 %v2225_v51, %v447_v14  ;;  %v1813_v22 = vpop.f32.mrb[4].mxu1  ;;  %v2275_v23 = vsel %vm444_vm2, 0.0, %v412_v11 }
 0x107   :  { %v2278_v24 = vsel %vm493_vm3, %v461_v12, 0.0  ;;  %v415_v25 = vrot.slane %v247_v17, 7  ;;  %v464_v26 = vrot.slane %v247_v17, 1  ;;  %v197_v27 = vpop.f32.mrb[5].mxu1  ;;  %v706_v30 = vmul.f32 %v2227_v52, %v496_v15 }
 0x108   :  { %v2280_v28 = vadd.f32 %v538_v8, %v518_v18  ;;  %v686_v29 = vadd.f32 %v670_v10, %v650_v20  ;;  %v648_v31 = vmul.f32 %v2225_v51, %v2275_v23  ;;  %v1814_v32 = vpop.f32.mrb[6].mxu1  ;;  %v2292_v34 = vmul.f32 %v2227_v52, %v2278_v24 }
 0x109   :  { %v448_v35 = vsel %vm444_vm2, 0.0, %v415_v25  ;;  %v497_v36 = vsel %vm493_vm3, %v464_v26, 0.0  ;;  %v539_v37 = vmul.f32 %v2214_v44, %v247_v17  ;;  %v200_v38 = vpop.f32.mrb[7].mxu1  ;;  %v671_v47 = vmul.f32 %v2216_v45, %v247_v17 }
 0x10a   :  { %v722_v39 = vadd.f32 %v706_v30, %v686_v29  ;;  %v2297_v40 = vadd.f32 %v668_v16, %v648_v31  ;;  %v519_v41 = vmul.f32 %v2220_v48, %v448_v35  ;;  %v2302_v50 = vmul.f32 %v2222_v49, %v497_v36 }
 0x10b   :  { %v651_v53 = vmul.f32 %v2225_v51, %v448_v35  ;;  %v413_v56 = vrot.slane %v245_v21, 7  ;;  %v462_v57 = vrot.slane %v245_v21, 1  ;;  %v707_v63 = vmul.f32 %v2227_v52, %v497_v36 }
 0x10c   :  { %v2306_v61 = vadd.f32 %v2288_v33, %v722_v39  ;;  %v2308_v62 = vadd.f32 %v539_v37, %v519_v41  ;;  %v2312_v2 = vmul.f32 %v2214_v44, %v245_v21  ;;  %v206_v8 = vadd.f32 %v1813_v22, %v2210_v42 }
 0x10d   :  { %v687_v3 = vadd.f32 %v671_v47, %v651_v53  ;;  %v2315_v6 = vsel %vm444_vm2, 0.0, %v413_v56  ;;  %v2318_v7 = vsel %vm493_vm3, %v462_v57, 0.0  ;;  %v669_v12 = vmul.f32 %v2216_v45, %v245_v21 }
 0x10e   :  { %v649_v11 = vmul.f32 %v2225_v51, %v2315_v6  ;;  %v198_v14 = vadd.f32 %v2210_v42, %v197_v27  ;;  %v1817_v15 = vpop.f32.mrb[8].mxu1  ;;  %v2328_v17 = vmul.f32 %v2227_v52, %v2318_v7  ;;  %v250_v18 = vmax.f32 %v206_v8, 0.0 }
 0x10f   :  { %v723_v16 = vadd.f32 %v707_v63, %v687_v3  ;;  %v209_v20 = vadd.f32 %v1814_v32, %v2210_v42  ;;  %v213_v25 = vpop.f32.mrb[9].mxu1  ;;  %v201_v29 = vadd.f32 %v2210_v42, %v200_v38  ;;  %v222_v30 = vadd.f32 %v1817_v15, %v2210_v42 }
 0x110   :  { %v2331_v22 = vadd.f32 %v669_v12, %v649_v11  ;;  %v248_v26 = vmax.f32 %v198_v14, 0.0  ;;  %v1818_v21 = vpop.f32.mrb[10].mxu1  ;;  %v418_v31 = vrot.slane %v250_v18, 7  ;;  %v467_v35 = vrot.slane %v250_v18, 1 }
 0x111   :  { %v2336_v27 = vadd.f32 %v2288_v33, %v723_v16  ;;  %v214_v36 = vadd.f32 %v2210_v42, %v213_v25  ;;  %v216_v37 = vpop.f32.mrb[11].mxu1  ;;  %v542_v39 = vmul.f32 %v2214_v44, %v250_v18  ;;  %v674_v32 = vmul.f32 %v2216_v45, %v250_v18 }
 0x112   :  { %v416_v41 = vrot.slane %v248_v26, 7  ;;  %v465_v47 = vrot.slane %v248_v26, 1  ;;  %v451_v38 = vsel %vm444_vm2, 0.0, %v418_v31  ;;  %v500_v56 = vsel %vm493_vm3, %v467_v35, 0.0 }
 0x113   :  { %v540_v57 = vmul.f32 %v2214_v44, %v248_v26  ;;  %v522_v63 = vmul.f32 %v2220_v48, %v451_v38  ;;  %v2347_v3 = vmul.f32 %v2222_v49, %v500_v56  ;;  %v654_v8 = vmul.f32 %v2225_v51, %v451_v38 }
 0x114   :  { %v672_v11 = vmul.f32 %v2216_v45, %v248_v26  ;;  %v449_v12 = vsel %vm444_vm2, 0.0, %v416_v41  ;;  %v498_v14 = vsel %vm493_vm3, %v465_v47, 0.0  ;;  %v251_v15 = vmax.f32 %v209_v20, 0.0 }
 0x115   :  { %3176 = vst [vmem:[#allocation18_spill] sm:$0xff] %v2347_v3  ;;  %v249_v16 = vmax.f32 %v201_v29, 0.0  ;;  %v2353_v18 = vadd.f32 %v542_v39, %v522_v63  ;;  %v2355_v25 = vadd.f32 %v674_v32, %v654_v8  ;;  %v2358_v31 = vmul.f32 %v2227_v52, %v500_v56 }
 0x116   :  { %v520_v35 = vmul.f32 %v2220_v48, %v449_v12  ;;  %v2361_v53 = vpop.f32.mrb[12].mxu1  ;;  %v2364_v38 = vmul.f32 %v2222_v49, %v498_v14  ;;  %v652_v26 = vmul.f32 %v2225_v51, %v449_v12  ;;  %v419_v41 = vrot.slane %v251_v15, 7 }
 0x117   :  { %3177 = vst [vmem:[#allocation19_spill] sm:$0xff] %v2353_v18  ;;  %v468_v47 = vrot.slane %v251_v15, 1  ;;  %v2367_v20 = vpop.f32.mrb[13].mxu1  ;;  %v2372_v39 = vmul.f32 %v2227_v52, %v498_v14  ;;  %v543_v32 = vmul.f32 %v2214_v44, %v251_v15  ;;  %v417_v56 = vrot.slane %v249_v16, 7 }
 0x118   :  { %v2369_v29 = vadd.f32 %v540_v57, %v520_v35  ;;  %v2375_v63 = vpop.f32.mrb[14].mxu1  ;;  %v452_v8 = vsel %vm444_vm2, 0.0, %v419_v41  ;;  %v675_v12 = vmul.f32 %v2216_v45, %v251_v15  ;;  %v466_v5 = vrot.slane %v249_v16, 1 }
 0x119   :  { %v501_v10 = vsel %vm493_vm3, %v468_v47, 0.0  ;;  %v2380_v9 = vpop.f32.mrb[15].mxu1  ;;  %v2382_v4 = vadd.f32 %v672_v11, %v652_v26  ;;  %v523_v57 = vmul.f32 %v2220_v48, %v452_v8  ;;  %v655_v35 = vmul.f32 %v2225_v51, %v452_v8 }
 0x11a   :  { %v2386_v14 = vmul.f32 %v2222_v49, %v501_v10  ;;  %v2390_v1 = vmul.f32 %v2227_v52, %v501_v10  ;;  %v450_v41 = vsel %vm444_vm2, 0.0, %v417_v56  ;;  %v499_v47 = vsel %vm493_vm3, %v466_v5, 0.0 }
 0x11b   :  { %v541_v15 = vmul.f32 %v2214_v44, %v249_v16  ;;  %v2395_v0 = vadd.f32 %v543_v32, %v523_v57  ;;  %v2397_v11 = vadd.f32 %v675_v12, %v655_v35  ;;  %v521_v26 = vmul.f32 %v2220_v48, %v450_v41 }
 0x11c   :  { %3178 = vst [vmem:[#allocation20_spill] sm:$0xff] %v2386_v14  ;;  %v673_v60 = vmul.f32 %v2216_v45, %v249_v16  ;;  %v2402_v59 = vmul.f32 %v2222_v49, %v499_v47  ;;  %v653_v10 = vmul.f32 %v2225_v51, %v450_v41  ;;  %v254_v8 = vmax.f32 %v222_v30, 0.0 }
 0x11d   :  { %3179 = vst [vmem:[#allocation21_spill] sm:$0xff] %v2395_v0  ;;  %v252_v46 = vmax.f32 %v214_v36, 0.0  ;;  %v2405_v56 = vadd.f32 %v541_v15, %v521_v26  ;;  %v2408_v5 = vmul.f32 %v2227_v52, %v499_v47  ;;  %v225_v32 = vadd.f32 %v1818_v21, %v2210_v42 }
 0x11e   :  { %v217_v12 = vadd.f32 %v2210_v42, %v216_v37  ;;  %v2412_v57 = vpop.f32.mrb[16].mxu1  ;;  %v2414_v35 = vadd.f32 %v673_v60, %v653_v10  ;;  %v422_v16 = vrot.slane %v254_v8, 7  ;;  %v471_v58 = vrot.slane %v254_v8, 1 }
 0x11f   :  { %v720_v41 = vadd.f32 %v2292_v34, %v2297_v40  ;;  %v2418_v30 = vpop.f32.mrb[17].mxu1  ;;  %v546_v36 = vmul.f32 %v2214_v44, %v254_v8  ;;  %v678_v47 = vmul.f32 %v2216_v45, %v254_v8  ;;  %v420_v15 = vrot.slane %v252_v46, 7 }
 0x120   :  { %3180 = vst [vmem:[#allocation22_spill] sm:$0xff] %v2418_v30  ;;  %v469_v26 = vrot.slane %v252_v46, 1  ;;  %v2422_v21 = vpop.f32.mrb[18].mxu1  ;;  %v455_v37 = vsel %vm444_vm2, 0.0, %v422_v16  ;;  %v504_v60 = vsel %vm493_vm3, %v471_v58, 0.0  ;;  %v544_v10 = vmul.f32 %v2214_v44, %v252_v46 }
 0x121   :  { %3181 = vst [vmem:[#allocation23_spill] sm:$0xff] %v2422_v21  ;;  %v255_v43 = vmax.f32 %v225_v32, 0.0  ;;  %v2427_v14 = vpop.f32.mrb[19].mxu1  ;;  %v526_v34 = vmul.f32 %v2220_v48, %v455_v37  ;;  %v2431_v40 = vmul.f32 %v2222_v49, %v504_v60  ;;  %v658_v8 = vmul.f32 %v2225_v51, %v455_v37 }
 0x122   :  { %3182 = vst [vmem:[#allocation24_spill] sm:$0xff] %v2427_v14  ;;  %v676_v30 = vmul.f32 %v2216_v45, %v252_v46  ;;  %v453_v21 = vsel %vm444_vm2, 0.0, %v420_v15  ;;  %v502_v16 = vsel %vm493_vm3, %v469_v26, 0.0  ;;  %v2442_v14 = vmul.f32 %v2227_v52, %v504_v60 }
 0x123   :  { %3183 = vst [vmem:[#allocation25_spill] sm:$0xff] %v2431_v40  ;;  %v423_v0 = vrot.slane %v255_v43, 7  ;;  %v472_v58 = vrot.slane %v255_v43, 1  ;;  %v2437_v3 = vadd.f32 %v546_v36, %v526_v34  ;;  %v2439_v32 = vadd.f32 %v678_v47, %v658_v8 }
 0x124   :  { %3185 = vst [vmem:[#allocation27_spill] sm:$0xff] %v2442_v14  ;;  %v524_v18 = vmul.f32 %v2220_v48, %v453_v21  ;;  %v2446_v40 = vmul.f32 %v2222_v49, %v502_v16  ;;  %v656_v46 = vmul.f32 %v2225_v51, %v453_v21  ;;  %v2454_v36 = vmul.f32 %v2227_v52, %v502_v16 }
 0x125   :  { %3184 = vst [vmem:[#allocation26_spill] sm:$0xff] %v2437_v3  ;;  %v456_v15 = vsel %vm444_vm2, 0.0, %v423_v0  ;;  %v505_v26 = vsel %vm493_vm3, %v472_v58, 0.0  ;;  %v547_v60 = vmul.f32 %v2214_v44, %v255_v43  ;;  %v679_v21 = vmul.f32 %v2216_v45, %v255_v43 }
 0x126   :  { %v2451_v37 = vadd.f32 %v544_v10, %v524_v18  ;;  %v527_v47 = vmul.f32 %v2220_v48, %v456_v15  ;;  %v2458_v34 = vpop.f32.mrb[20].mxu1  ;;  %v2460_v8 = vadd.f32 %v676_v30, %v656_v46  ;;  %v2463_v3 = vmul.f32 %v2222_v49, %v505_v26 }
 0x127   :  { %v659_v0 = vmul.f32 %v2225_v51, %v456_v15  ;;  %v2467_v18 = vpop.f32.mrb[21].mxu1  ;;  %v2472_v16 = vmul.f32 %v2227_v52, %v505_v26  ;;  %v253_v58 = vmax.f32 %v217_v12, 0.0  ;;  %v721_v30 = vadd.f32 %v2328_v17, %v2331_v22 }
 0x128   :  { %3186 = vst [vmem:[#allocation28_spill] sm:$0xff] %v2463_v3  ;;  %3187 = vst [vmem:[#allocation29_spill] sm:$0xff] %v2467_v18  ;;  %v2469_v10 = vadd.f32 %v547_v60, %v527_v47  ;;  %v2476_v46 = vpop.f32.mrb[22].mxu1  ;;  %v742_v15 = vadd.f32 %v2288_v33, %v720_v41  ;;  %v516_v43 = vmul.f32 %v2220_v48, %v2275_v23 }
 0x129   :  { %3189 = vst [vmem:[#allocation31_spill] sm:$0xff] %v2472_v16  ;;  %3190 = vst [vmem:[#allocation32_spill] sm:$0xff] %v2476_v46  ;;  %v2478_v14 = vadd.f32 %v679_v21, %v659_v0  ;;  %v517_v47 = vmul.f32 %v2220_v48, %v2315_v6  ;;  %v2485_v60 = vpop.f32.mrb[23].mxu1  ;;  %v421_v26 = vrot.slane %v253_v58, 7  ;;  %v470_v18 = vrot.slane %v253_v58, 1 }
 0x12a   :  { %3188 = vst [vmem:[#allocation30_spill] sm:$0xff] %v2469_v10  ;;  %3192 = vst [vmem:[#allocation34_spill] sm:$0xff] %v2485_v60  ;;  %v545_v12 = vmul.f32 %v2214_v44, %v253_v58  ;;  %v572_v17 = vmul.f32 %v2222_v49, %v2278_v24  ;;  %v677_v22 = vmul.f32 %v2216_v45, %v253_v58  ;;  %v3193_v10 = vmax.f32 %v2306_v61, 0.0 }
 0x12b   :  { %3191 = vst [vmem:[#allocation33_spill] sm:$0xff] %v2478_v14  ;;  %v743_v0 = vadd.f32 %v2288_v33, %v721_v30  ;;  %v552_v41 = vadd.f32 %v2264_v13, %v516_v43  ;;  %v553_v23 = vadd.f32 %v2312_v2, %v517_v47  ;;  %v454_v21 = vsel %vm444_vm2, 0.0, %v421_v26  ;;  %v2508_v2 = vld [vmem:[%s3132_s6] ss:$0 sm:$0xff] }
 0x12c   :  { %v503_v6 = vsel %vm493_vm3, %v470_v18, 0.0  ;;  %v573_v60 = vmul.f32 %v2222_v49, %v2318_v7  ;;  %v238_v46 = vadd.f32 %v2361_v53, %v2210_v42  ;;  %v525_v24 = vmul.f32 %v2220_v48, %v454_v21 }
 0x12d   :  { %v2502_v58 = vmul.f32 %v2222_v49, %v503_v6  ;;  %v657_v30 = vmul.f32 %v2225_v51, %v454_v21  ;;  %v758_v13 = vmax.f32 %v742_v15, 0.0  ;;  %v759_v18 = vmax.f32 %v743_v0, 0.0 }
 0x12e   :  { %v588_v43 = vadd.f32 %v572_v17, %v552_v41  ;;  %v589_v47 = vadd.f32 %v573_v60, %v553_v23  ;;  %v258_v7 = vmax.f32 %v238_v46, 0.0  ;;  %v2510_v26 = vpop.f32.mrb[24].mxu1  ;;  %v2512_v53 = vadd.f32 %v545_v12, %v525_v24 }
 0x12f   :  { %v2515_v3 = vmul.f32 %v2227_v52, %v503_v6  ;;  %v3194_v15 = vmax.f32 %v2336_v27, 0.0  ;;  %v590_v16 = vadd.f32 %v2271_v19, %v2280_v28  ;;  %v2523_v14 = vpop.f32.mrb[25].mxu1  ;;  %v1043_v17 = vpack.c.bf16 %v759_v18, %v758_v13 }
 0x130   :  { %v610_v46 = vadd.f32 %v2508_v2, %v588_v43  ;;  %v611_v60 = vadd.f32 %v2508_v2, %v589_v47  ;;  %v426_v12 = vrot.slane %v258_v7, 7  ;;  %v2527_v0 = vpop.f32.mrb[26].mxu1  ;;  %v2529_v41 = vadd.f32 %v677_v22, %v657_v30 }
 0x131   :  { %v1044_v21 = vpack.c.bf16 %v3194_v15, %v3193_v10  ;;  %v475_v23 = vrot.slane %v258_v7, 1  ;;  %v550_v61 = vmul.f32 %v2214_v44, %v258_v7  ;;  %v591_v27 = vadd.f32 %v2302_v50, %v2308_v62  ;;  %v2534_v10 = vpop.f32.mrb[27].mxu1  ;;  %1845 = vmatprep.mubr.msk.bf16.mxu1 %vm1052_vm4, %v1043_v17 }
 0x132   :  { %v626_v19 = vmax.f32 %v610_v46, 0.0  ;;  %v627_v28 = vmax.f32 %v611_v60, 0.0  ;;  %v459_v6 = vsel %vm444_vm2, 0.0, %v426_v12  ;;  %v612_v24 = vadd.f32 %v2508_v2, %v590_v16 }
 0x133   :  { %v508_v13 = vsel %vm493_vm3, %v475_v23, 0.0  ;;  %v530_v22 = vmul.f32 %v2220_v48, %v459_v6  ;;  %v662_v30 = vmul.f32 %v2225_v51, %v459_v6  ;;  %1846 = vmatmul.mubr.msk.bf16.vlgmr.msra.gmra.mrb[32].mxu1 %vm1052_vm4, %v1044_v21  ;;  %v613_v50 = vadd.f32 %v2508_v2, %v591_v27 }
 0x134   :  { %v1034_v62 = vpack.c.bf16 %v627_v28, %v626_v19  ;;  %v2545_v18 = vmul.f32 %v2222_v49, %v508_v13  ;;  %v682_v43 = vmul.f32 %v2216_v45, %v258_v7  ;;  %v2549_v47 = vmul.f32 %v2227_v52, %v508_v13 }
 0x135   :  { %v2551_v16 = vadd.f32 %v550_v61, %v530_v22  ;;  %v628_v15 = vmax.f32 %v612_v24, 0.0  ;;  %v629_v17 = vmax.f32 %v613_v50, 0.0  ;;  %v230_v46 = vadd.f32 %v2210_v42, %v2367_v20 }
 0x136   :  { %1863 = vmatprep.mubr.msk.bf16.mxu0 %vm1052_vm4, %v1034_v62  ;;  %v241_v21 = vadd.f32 %v2375_v63, %v2210_v42  ;;  %v233_v60 = vadd.f32 %v2210_v42, %v2380_v9  ;;  %v724_v7 = vadd.f32 %v2372_v39, %v2382_v4  ;;  %v725_v12 = vadd.f32 %v2408_v5, %v2414_v35  ;;  %v2564_v23 = vpop.f32.mrb[28].mxu1 }
 0x137   :  { %v2566_v61 = vadd.f32 %v682_v43, %v662_v30  ;;  %v1035_v27 = vpack.c.bf16 %v629_v17, %v628_v15  ;;  %v256_v20 = vmax.f32 %v230_v46, 0.0  ;;  %v592_v19 = vadd.f32 %v2364_v38, %v2369_v29  ;;  %v2570_v28 = vpop.f32.mrb[29].mxu1 }
 0x138   :  { %v259_v63 = vmax.f32 %v241_v21, 0.0  ;;  %v257_v6 = vmax.f32 %v233_v60, 0.0  ;;  %v746_v42 = vadd.f32 %v2288_v33, %v724_v7  ;;  %v593_v4 = vadd.f32 %v2402_v59, %v2405_v56  ;;  %v2575_v9 = vpop.f32.mrb[30].mxu1 }
 0x139   :  { %3195 = vst [vmem:[#allocation35_spill] sm:$0xff] %v2575_v9  ;;  %1864 = vmatmul.mubr.msk.bf16.vlgmr.msra.gmra.mrb[0].mxu0 %vm1052_vm4, %v1035_v27  ;;  %v424_v39 = vrot.slane %v256_v20, 7  ;;  %v473_v5 = vrot.slane %v256_v20, 1  ;;  %v548_v35 = vmul.f32 %v2214_v44, %v256_v20  ;;  %v747_v24 = vadd.f32 %v2288_v33, %v725_v12  ;;  %v2580_v38 = vpop.f32.mrb[31].mxu1 }
 0x13a   :  { %3196 = vst [vmem:[#allocation36_spill] sm:$0xff] %v2580_v38  ;;  %v680_v29 = vmul.f32 %v2216_v45, %v256_v20  ;;  %1880 = vmatpush3.bf16.msra.mxu0 %v2230_v54  ;;  %v427_v13 = vrot.slane %v259_v63, 7  ;;  %v476_v22 = vrot.slane %v259_v63, 1  ;;  %v551_v59 = vmul.f32 %v2214_v44, %v259_v63  ;;  %v3216_v38 = vld [vmem:[#allocation31_spill] sm:$0xff] }
 0x13b   :  { %v457_v56 = vsel %vm444_vm2, 0.0, %v424_v39  ;;  %v506_v30 = vsel %vm493_vm3, %v473_v5, 0.0  ;;  %v425_v50 = vrot.slane %v257_v6, 7  ;;  %v474_v62 = vrot.slane %v257_v6, 1  ;;  %1966 = vmatprep.subr.msk.bf16.mxu0 %vm1077_vm1, %v2235_v55 }
 0x13c   :  { %v528_v43 = vmul.f32 %v2220_v48, %v457_v56  ;;  %v2591_v15 = vmul.f32 %v2222_v49, %v506_v30  ;;  %v660_v54 = vmul.f32 %v2225_v51, %v457_v56  ;;  %v683_v17 = vmul.f32 %v2216_v45, %v259_v63 }
 0x13d   :  { %v460_v46 = vsel %vm444_vm2, 0.0, %v427_v13  ;;  %v509_v21 = vsel %vm493_vm3, %v476_v22, 0.0  ;;  %v458_v60 = vsel %vm444_vm2, 0.0, %v425_v50  ;;  %v507_v7 = vsel %vm493_vm3, %v474_v62, 0.0 }
 0x13e   :  { %v2599_v12 = vadd.f32 %v548_v35, %v528_v43  ;;  %v2601_v55 = vadd.f32 %v680_v29, %v660_v54  ;;  %v2604_v27 = vmul.f32 %v2227_v52, %v506_v30  ;;  %v531_v20 = vmul.f32 %v2220_v48, %v460_v46  ;;  %v2625_v30 = vld [vmem:[%s3130_s4] ss:$0 sm:$0xff] }
 0x13f   :  { %v2608_v39 = vmul.f32 %v2222_v49, %v509_v21  ;;  %v663_v63 = vmul.f32 %v2225_v51, %v460_v46  ;;  %v529_v5 = vmul.f32 %v2220_v48, %v458_v60  ;;  %v549_v13 = vmul.f32 %v2214_v44, %v257_v6 }
 0x140   :  { %v2613_v22 = vadd.f32 %v551_v59, %v531_v20  ;;  %v2616_v35 = vmul.f32 %v2227_v52, %v509_v21  ;;  %v2619_v29 = vmul.f32 %v2222_v49, %v507_v7  ;;  %v661_v56 = vmul.f32 %v2225_v51, %v458_v60  ;;  %v3197_v21 = vld [vmem:[#allocation19_spill] sm:$0xff] }
 0x141   :  { %v2627_v50 = vadd.f32 %v683_v17, %v663_v63  ;;  %v2629_v48 = vadd.f32 %v549_v13, %v529_v5  ;;  %v681_v44 = vmul.f32 %v2216_v45, %v257_v6  ;;  %v2633_v59 = vmul.f32 %v2227_v52, %v507_v7  ;;  %v3198_v45 = vld [vmem:[#allocation18_spill] sm:$0xff]  ;;  %v3200_v7 = vld [vmem:[#allocation20_spill] sm:$0xff]  ;;  %v3202_v5 = vld [vmem:[#allocation23_spill] sm:$0xff] }
 0x142   :  { %v762_v62 = vmax.f32 %v746_v42, 0.0  ;;  %v763_v43 = vmax.f32 %v747_v24, 0.0  ;;  %v614_v49 = vadd.f32 %v2508_v2, %v592_v19  ;;  %v615_v51 = vadd.f32 %v2508_v2, %v593_v4  ;;  %v3199_v24 = vld [vmem:[#allocation21_spill] sm:$0xff] }
 0x143   :  { %v326_v54 = vadd.f32 %v2412_v57, %v2625_v30  ;;  %v726_v17 = vadd.f32 %v2358_v31, %v2355_v25  ;;  %v727_v46 = vadd.f32 %v2390_v1, %v2397_v11  ;;  %v594_v6 = vadd.f32 %v3198_v45, %v3197_v21  ;;  %v3201_v11 = vld [vmem:[#allocation22_spill] sm:$0xff] }
 0x144   :  { %v1045_v52 = vpack.c.bf16 %v763_v43, %v762_v62  ;;  %v630_v60 = vmax.f32 %v614_v49, 0.0  ;;  %v631_v42 = vmax.f32 %v615_v51, 0.0  ;;  %v595_v19 = vadd.f32 %v3200_v7, %v3199_v24  ;;  %v3203_v43 = vld [vmem:[#allocation8_spill] sm:$0xff]  ;;  %v3204_v51 = vld [vmem:[#allocation10_spill] sm:$0xff]  ;;  %v3207_v7 = vld [vmem:[#allocation11_spill] sm:$0xff] }
 0x145   :  { %v2647_v20 = vmax.f32 %v326_v54, 0.0  ;;  %v748_v4 = vadd.f32 %v2288_v33, %v726_v17  ;;  %v749_v57 = vadd.f32 %v2288_v33, %v727_v46  ;;  %v616_v25 = vadd.f32 %v2508_v2, %v594_v6  ;;  %v3205_v17 = vld [vmem:[#allocation9_spill] sm:$0xff] }
 0x146   :  { %1849 = vmatprep.mubr.msk.bf16.mxu1 %vm1052_vm4, %v1045_v52  ;;  %v1036_v1 = vpack.c.bf16 %v631_v42, %v630_v60  ;;  %v617_v31 = vadd.f32 %v2508_v2, %v595_v19  ;;  %v318_v63 = vadd.f32 %v2625_v30, %v3201_v11  ;;  %v329_v13 = vadd.f32 %v3202_v5, %v2625_v30 }
 0x147   :  { %v2658_v62 = vadd.f32 %v681_v44, %v661_v56  ;;  %v783_v49 = vmul.f32 %v3203_v43, %v2647_v20  ;;  %v801_v54 = vmul.f32 %v3204_v51, %v2647_v20  ;;  %v913_v46 = vmul.f32 %v3205_v17, %v2647_v20  ;;  %v3206_v56 = vld [vmem:[#allocation24_spill] sm:$0xff] }
 0x148   :  { %1867 = vmatprep.mubr.msk.bf16.mxu0 %vm1052_vm4, %v1036_v1  ;;  %v764_v21 = vmax.f32 %v748_v4, 0.0  ;;  %v765_v45 = vmax.f32 %v749_v57, 0.0  ;;  %v632_v6 = vmax.f32 %v616_v25, 0.0  ;;  %v633_v52 = vmax.f32 %v617_v31, 0.0 }
 0x149   :  { %v380_v60 = vmax.f32 %v318_v63, 0.0  ;;  %v2667_v42 = vmax.f32 %v329_v13, 0.0  ;;  %v321_v44 = vadd.f32 %v2625_v30, %v3206_v56  ;;  %v728_v24 = vadd.f32 %v2454_v36, %v2460_v8  ;;  %v3209_v63 = vld [vmem:[#allocation12_spill] sm:$0xff] }
 0x14a   :  { %v931_v19 = vmul.f32 %v3207_v7, %v2647_v20  ;;  %v1046_v11 = vpack.c.bf16 %v765_v45, %v764_v21  ;;  %v1037_v5 = vpack.c.bf16 %v633_v52, %v632_v6  ;;  %v729_v4 = vadd.f32 %v2515_v3, %v2529_v41  ;;  %v3210_v21 = vld [vmem:[#allocation13_spill] sm:$0xff] }
 0x14b   :  { %v2678_v57 = vmul.f32 %v3203_v43, %v380_v60  ;;  %v799_v25 = vmul.f32 %v3204_v51, %v380_v60  ;;  %v929_v1 = vmul.f32 %v3207_v7, %v380_v60  ;;  %v596_v31 = vadd.f32 %v2446_v40, %v2451_v37  ;;  %v3212_v37 = vld [vmem:[#allocation14_spill] sm:$0xff] }
 0x14c   :  { %1850 = vmatmul.mubr.msk.bf16.gmra.mrb[36].mxu1 %vm1052_vm4, %v1046_v11  ;;  %1868 = vmatmul.mubr.msk.bf16.gmra.mrb[4].mxu0 %vm1052_vm4, %v1037_v5  ;;  %v2687_v36 = vmul.f32 %v3205_v17, %v380_v60  ;;  %v802_v3 = vmul.f32 %v3204_v51, %v2667_v42  ;;  %v932_v8 = vmul.f32 %v3207_v7, %v2667_v42  ;;  %v2693_v41 = vmax.f32 %v321_v44, 0.0 }
 0x14d   :  { %v2696_v13 = vadd.f32 %v799_v25, %v3209_v63  ;;  %v2699_v40 = vadd.f32 %v929_v1, %v3210_v21  ;;  %v2703_v45 = vmul.f32 %v3212_v37, %v2667_v42  ;;  %v750_v6 = vadd.f32 %v2288_v33, %v728_v24 }
 0x14e   :  { %3208 = vst [vmem:[#allocation19_spill] sm:$0xff] %v2687_v36  ;;  %v818_v52 = vadd.f32 %v802_v3, %v783_v49  ;;  %v948_v60 = vadd.f32 %v932_v8, %v913_v46  ;;  %v782_v56 = vmul.f32 %v3203_v43, %v2693_v41  ;;  %v912_v44 = vmul.f32 %v3205_v17, %v2693_v41  ;;  %v3214_v46 = vld [vmem:[#allocation27_spill] sm:$0xff] }
 0x14f   :  { %3211 = vst [vmem:[#allocation18_spill] sm:$0xff] %v2699_v40  ;;  %v751_v11 = vadd.f32 %v2288_v33, %v729_v4  ;;  %v766_v5 = vmax.f32 %v750_v6, 0.0  ;;  %v597_v25 = vadd.f32 %v2502_v58, %v2512_v53  ;;  %v618_v1 = vadd.f32 %v2508_v2, %v596_v31  ;;  %v3215_v6 = vld [vmem:[#allocation33_spill] sm:$0xff] }
 0x150   :  { %v2714_v40 = vadd.f32 %v801_v54, %v782_v56  ;;  %v2716_v36 = vadd.f32 %v931_v19, %v912_v44  ;;  %v342_v49 = vadd.f32 %v2458_v34, %v2625_v30  ;;  %v730_v24 = vadd.f32 %v3214_v46, %v2439_v32  ;;  %v3217_v54 = vld [vmem:[#allocation26_spill] sm:$0xff]  ;;  %v3218_v19 = vld [vmem:[#allocation25_spill] sm:$0xff]  ;;  %v3220_v44 = vld [vmem:[#allocation28_spill] sm:$0xff] }
 0x151   :  { %v767_v3 = vmax.f32 %v751_v11, 0.0  ;;  %v619_v8 = vadd.f32 %v2508_v2, %v597_v25  ;;  %v634_v4 = vmax.f32 %v618_v1, 0.0  ;;  %v731_v9 = vadd.f32 %v3216_v38, %v3215_v6  ;;  %v3219_v56 = vld [vmem:[#allocation30_spill] sm:$0xff]  ;;  %v3221_v11 = vld [vmem:[#allocation29_spill] sm:$0xff]  ;;  %v3222_v1 = vld [vmem:[#allocation15_spill] sm:$0xff] }
 0x152   :  { %3213 = vst [vmem:[#allocation21_spill] sm:$0xff] %v2716_v36  ;;  %v2725_v58 = vmax.f32 %v342_v49, 0.0  ;;  %v752_v53 = vadd.f32 %v2288_v33, %v730_v24  ;;  %v598_v31 = vadd.f32 %v3218_v19, %v3217_v54  ;;  %v599_v34 = vadd.f32 %v3220_v44, %v3219_v56  ;;  %v3223_v24 = vld [vmem:[#allocation32_spill] sm:$0xff] }
 0x153   :  { %v1047_v36 = vpack.c.bf16 %v767_v3, %v766_v5  ;;  %v635_v21 = vmax.f32 %v619_v8, 0.0  ;;  %v753_v32 = vadd.f32 %v2288_v33, %v731_v9  ;;  %v334_v25 = vadd.f32 %v2625_v30, %v3221_v11 }
 0x154   :  { %v2737_v38 = vmul.f32 %v3222_v1, %v2667_v42  ;;  %v620_v49 = vadd.f32 %v2508_v2, %v598_v31  ;;  %v621_v46 = vadd.f32 %v2508_v2, %v599_v34  ;;  %v345_v6 = vadd.f32 %v3223_v24, %v2625_v30 }
 0x155   :  { %1853 = vmatprep.mubr.msk.bf16.mxu1 %vm1052_vm4, %v1047_v36  ;;  %v1038_v5 = vpack.c.bf16 %v635_v21, %v634_v4  ;;  %v768_v3 = vmax.f32 %v752_v53, 0.0  ;;  %v769_v8 = vmax.f32 %v753_v32, 0.0  ;;  %v2744_v9 = vmax.f32 %v334_v25, 0.0  ;;  %v3224_v21 = vld [vmem:[#allocation34_spill] sm:$0xff] }
 0x156   :  { %v636_v54 = vmax.f32 %v620_v49, 0.0  ;;  %v637_v19 = vmax.f32 %v621_v46, 0.0  ;;  %v387_v56 = vmax.f32 %v345_v6, 0.0  ;;  %v787_v44 = vmul.f32 %v3203_v43, %v2725_v58 }
 0x157   :  { %1871 = vmatprep.mubr.msk.bf16.mxu0 %vm1052_vm4, %v1038_v5  ;;  %v1048_v31 = vpack.c.bf16 %v769_v8, %v768_v3  ;;  %v838_v34 = vmul.f32 %v3212_v37, %v2744_v9  ;;  %v968_v36 = vmul.f32 %v3222_v1, %v2744_v9  ;;  %v337_v4 = vadd.f32 %v2625_v30, %v3224_v21 }
 0x158   :  { %v1039_v53 = vpack.c.bf16 %v637_v19, %v636_v54  ;;  %v806_v32 = vmul.f32 %v3204_v51, %v387_v56  ;;  %v917_v11 = vmul.f32 %v3205_v17, %v2725_v58  ;;  %v936_v25 = vmul.f32 %v3207_v7, %v387_v56 }
 0x159   :  { %1854 = vmatmul.mubr.msk.bf16.gmra.mrb[40].mxu1 %vm1052_vm4, %v1048_v31  ;;  %v853_v49 = vadd.f32 %v838_v34, %v818_v52  ;;  %v2760_v46 = vadd.f32 %v968_v36, %v948_v60  ;;  %v2763_v24 = vmul.f32 %v3212_v37, %v387_v56  ;;  %v2766_v6 = vmul.f32 %v3222_v1, %v387_v56 }
 0x15a   :  { %1872 = vmatmul.mubr.msk.bf16.gmra.mrb[8].mxu0 %vm1052_vm4, %v1039_v53  ;;  %v2769_v5 = vadd.f32 %v806_v32, %v787_v44  ;;  %v2771_v3 = vadd.f32 %v936_v25, %v917_v11  ;;  %v732_v8 = vadd.f32 %v2604_v27, %v2601_v55  ;;  %v733_v52 = vadd.f32 %v2633_v59, %v2658_v62 }
 0x15b   :  { %v2777_v60 = vmax.f32 %v337_v4, 0.0  ;;  %v600_v54 = vadd.f32 %v2591_v15, %v2599_v12  ;;  %v601_v19 = vadd.f32 %v2619_v29, %v2629_v48  ;;  %v734_v56 = vadd.f32 %v2549_v47, %v2566_v61 }
 0x15c   :  { %v754_v44 = vadd.f32 %v2288_v33, %v732_v8  ;;  %v755_v31 = vadd.f32 %v2288_v33, %v733_v52  ;;  %v735_v55 = vadd.f32 %v2616_v35, %v2627_v50  ;;  %v602_v27 = vadd.f32 %v2545_v18, %v2551_v16 }
 0x15d   :  { %v622_v59 = vadd.f32 %v2508_v2, %v600_v54  ;;  %v623_v15 = vadd.f32 %v2508_v2, %v601_v19  ;;  %v358_v12 = vadd.f32 %v2510_v26, %v2625_v30  ;;  %v756_v29 = vadd.f32 %v2288_v33, %v734_v56  ;;  %v2825_v19 = vld [vmem:[%s3136_s10] ss:$0 sm:$0xff] }
 0x15e   :  { %v770_v47 = vmax.f32 %v754_v44, 0.0  ;;  %v771_v61 = vmax.f32 %v755_v31, 0.0  ;;  %v757_v48 = vadd.f32 %v2288_v33, %v735_v55  ;;  %v603_v62 = vadd.f32 %v2608_v39, %v2613_v22 }
 0x15f   :  { %v638_v35 = vmax.f32 %v622_v59, 0.0  ;;  %v639_v50 = vmax.f32 %v623_v15, 0.0  ;;  %v772_v34 = vmax.f32 %v756_v29, 0.0  ;;  %v624_v18 = vadd.f32 %v2508_v2, %v602_v27 }
 0x160   :  { %v1049_v16 = vpack.c.bf16 %v771_v61, %v770_v47  ;;  %v773_v36 = vmax.f32 %v757_v48, 0.0  ;;  %v625_v21 = vadd.f32 %v2508_v2, %v603_v62  ;;  %v350_v26 = vadd.f32 %v2625_v30, %v2523_v14 }
 0x161   :  { %v1040_v4 = vpack.c.bf16 %v639_v50, %v638_v35  ;;  %v640_v53 = vmax.f32 %v624_v18, 0.0  ;;  %v361_v33 = vadd.f32 %v2527_v0, %v2625_v30  ;;  %v353_v39 = vadd.f32 %v2625_v30, %v2534_v10 }
 0x162   :  { %1857 = vmatprep.mubr.msk.bf16.mxu1 %vm1052_vm4, %v1049_v16  ;;  %v1050_v22 = vpack.c.bf16 %v773_v36, %v772_v34  ;;  %v641_v32 = vmax.f32 %v625_v21, 0.0  ;;  %v388_v11 = vmax.f32 %v350_v26, 0.0  ;;  %v800_v25 = vmul.f32 %v3204_v51, %v2693_v41  ;;  %v3227_v36 = vld [vmem:[#allocation36_spill] sm:$0xff] }
 0x163   :  { %1875 = vmatprep.mubr.msk.bf16.mxu0 %vm1052_vm4, %v1040_v4  ;;  %v2811_v2 = vmax.f32 %v358_v12, 0.0  ;;  %v2813_v14 = vmax.f32 %v361_v33, 0.0  ;;  %v2815_v8 = vmax.f32 %v353_v39, 0.0  ;;  %v835_v0 = vmul.f32 %v3212_v37, %v2693_v41 }
 0x164   :  { %1858 = vmatmul.mubr.msk.bf16.gmra.mrb[44].mxu1 %vm1052_vm4, %v1050_v22  ;;  %v1041_v10 = vpack.c.bf16 %v641_v32, %v640_v53  ;;  %v788_v52 = vmul.f32 %v3203_v43, %v388_v11  ;;  %v807_v54 = vmul.f32 %v3204_v51, %v388_v11  ;;  %v836_v56 = vmul.f32 %v3212_v37, %v2647_v20 }
 0x165   :  { %v937_v44 = vmul.f32 %v3207_v7, %v388_v11  ;;  %v816_v31 = vadd.f32 %v800_v25, %v2678_v57  ;;  %v850_v55 = vadd.f32 %v835_v0, %v2696_v13  ;;  %v374_v27 = vadd.f32 %v2564_v23, %v2625_v30  ;;  %v3225_v23 = vld [vmem:[#allocation13_spill] sm:$0xff] }
 0x166   :  { %1876 = vmatmul.mubr.msk.bf16.gmra.mrb[12].mxu0 %vm1052_vm4, %v1041_v10  ;;  %v2836_v59 = vmul.f32 %v3205_v17, %v388_v11  ;;  %v852_v15 = vadd.f32 %v2703_v45, %v2714_v40  ;;  %v875_v12 = vadd.f32 %v2825_v19, %v853_v49  ;;  %v366_v29 = vadd.f32 %v2625_v30, %v2570_v28  ;;  %v3226_v40 = vld [vmem:[#allocation35_spill] sm:$0xff] }
 0x167   :  { %v823_v57 = vadd.f32 %v807_v54, %v3209_v63  ;;  %v851_v47 = vadd.f32 %v836_v56, %v816_v31  ;;  %v872_v13 = vadd.f32 %v2825_v19, %v850_v55  ;;  %v2845_v61 = vmax.f32 %v374_v27, 0.0 }
 0x168   :  { %v2848_v48 = vadd.f32 %v937_v44, %v3225_v23  ;;  %v874_v62 = vadd.f32 %v2825_v19, %v852_v15  ;;  %v891_v35 = vmax.f32 %v875_v12, 0.0  ;;  %v377_v45 = vadd.f32 %v3226_v40, %v2625_v30  ;;  %v3228_v12 = vld [vmem:[#allocation17_spill] sm:$0xff] }
 0x169   :  { %v873_v49 = vadd.f32 %v2825_v19, %v851_v47  ;;  %v888_v50 = vmax.f32 %v872_v13, 0.0  ;;  %v2854_v28 = vmax.f32 %v366_v29, 0.0  ;;  %v794_v63 = vmul.f32 %v3203_v43, %v2845_v61 }
 0x16a   :  { %v890_v34 = vmax.f32 %v874_v62, 0.0  ;;  %v2858_v18 = vmax.f32 %v377_v45, 0.0  ;;  %v924_v16 = vmul.f32 %v3205_v17, %v2845_v61  ;;  %v369_v21 = vadd.f32 %v2625_v30, %v3227_v36 }
 0x16b   :  { %v889_v26 = vmax.f32 %v873_v49, 0.0  ;;  %v784_v4 = vmul.f32 %v3203_v43, %v2667_v42  ;;  %v803_v53 = vmul.f32 %v3204_v51, %v2744_v9  ;;  %v804_v33 = vmul.f32 %v3204_v51, %v2777_v60 }
 0x16c   :  { %v1303_v39 = vpack.c.bf16 %v891_v35, %v890_v34  ;;  %v814_v22 = vmul.f32 %v3204_v51, %v2858_v18  ;;  %v944_v32 = vmul.f32 %v3207_v7, %v2858_v18  ;;  %v785_v30 = vmul.f32 %v3203_v43, %v2744_v9  ;;  %v3229_v35 = vld [vmem:[#allocation16_spill] sm:$0xff] }
 0x16d   :  { %v1302_v11 = vpack.c.bf16 %v889_v26, %v888_v50  ;;  %v2878_v25 = vmul.f32 %v3212_v37, %v2858_v18  ;;  %v2880_v0 = vmax.f32 %v369_v21, 0.0  ;;  %v819_v10 = vadd.f32 %v803_v53, %v784_v4 }
 0x16e   :  { %v2882_v54 = vadd.f32 %v814_v22, %v794_v63  ;;  %v2884_v56 = vadd.f32 %v944_v32, %v924_v16  ;;  %v820_v44 = vadd.f32 %v804_v33, %v785_v30  ;;  %v839_v31 = vmul.f32 %v3212_v37, %v2777_v60 }
 0x16f   :  { %1881 = vmatprep.mubr.msk.bf16.mxu0 %vm1052_vm4, %v1302_v11  ;;  %v840_v55 = vmul.f32 %v3212_v37, %v2725_v58  ;;  %v786_v27 = vmul.f32 %v3203_v43, %v2777_v60  ;;  %v805_v15 = vmul.f32 %v3204_v51, %v2725_v58  ;;  %v857_v29 = vadd.f32 %v3228_v12, %v2769_v5 }
 0x170   :  { %1882 = vmatmul.mubr.msk.bf16.vlgmr.msra.gmra.mrb[0].mxu0 %vm1052_vm4, %v1303_v39  ;;  %v854_v47 = vadd.f32 %v839_v31, %v819_v10  ;;  %v808_v13 = vmul.f32 %v3204_v51, %v2815_v8  ;;  %v843_v23 = vmul.f32 %v3212_v37, %v2815_v8  ;;  %v844_v62 = vmul.f32 %v3212_v37, %v2811_v2 }
 0x171   :  { %1898 = vmatpush3.bf16.msra.mxu0 %v3229_v35  ;;  %v855_v40 = vadd.f32 %v840_v55, %v820_v44  ;;  %v821_v45 = vadd.f32 %v805_v15, %v786_v27  ;;  %v879_v49 = vadd.f32 %v2825_v19, %v857_v29  ;;  %v789_v5 = vmul.f32 %v3203_v43, %v2815_v8 }
 0x172   :  { %v876_v50 = vadd.f32 %v2825_v19, %v854_v47  ;;  %v824_v63 = vadd.f32 %v808_v13, %v788_v52  ;;  %v858_v34 = vadd.f32 %v843_v23, %v823_v57  ;;  %v790_v16 = vmul.f32 %v3203_v43, %v2811_v2 }
 0x173   :  { %v877_v36 = vadd.f32 %v2825_v19, %v855_v40  ;;  %v856_v21 = vadd.f32 %v2763_v24, %v821_v45  ;;  %v895_v26 = vmax.f32 %v879_v49, 0.0  ;;  %v809_v4 = vmul.f32 %v3204_v51, %v2811_v2 }
 0x174   :  { %v892_v53 = vmax.f32 %v876_v50, 0.0  ;;  %v859_v33 = vadd.f32 %v844_v62, %v824_v63  ;;  %v880_v39 = vadd.f32 %v2825_v19, %v858_v34  ;;  %v810_v22 = vmul.f32 %v3204_v51, %v2813_v14 }
 0x175   :  { %v893_v52 = vmax.f32 %v877_v36, 0.0  ;;  %v878_v57 = vadd.f32 %v2825_v19, %v856_v21  ;;  %v825_v32 = vadd.f32 %v809_v4, %v789_v5  ;;  %v845_v30 = vmul.f32 %v3212_v37, %v2813_v14 }
 0x176   :  { %v881_v24 = vadd.f32 %v2825_v19, %v859_v33  ;;  %v896_v11 = vmax.f32 %v880_v39, 0.0  ;;  %v826_v10 = vadd.f32 %v810_v22, %v790_v16  ;;  %v846_v44 = vmul.f32 %v3212_v37, %v2854_v28 }
 0x177   :  { %v1304_v31 = vpack.c.bf16 %v893_v52, %v892_v53  ;;  %v894_v55 = vmax.f32 %v878_v57, 0.0  ;;  %v860_v27 = vadd.f32 %v845_v30, %v825_v32  ;;  %v791_v15 = vmul.f32 %v3203_v43, %v2813_v14 }
 0x178   :  { %v897_v29 = vmax.f32 %v881_v24, 0.0  ;;  %v861_v47 = vadd.f32 %v846_v44, %v826_v10  ;;  %v792_v13 = vmul.f32 %v3203_v43, %v2854_v28  ;;  %v811_v23 = vmul.f32 %v3204_v51, %v2854_v28  ;;  %v3232_v10 = vld [vmem:[#allocation21_spill] sm:$0xff] }
 0x179   :  { %1885 = vmatprep.mubr.msk.bf16.mxu0 %vm1052_vm4, %v1304_v31  ;;  %v1305_v62 = vpack.c.bf16 %v895_v26, %v894_v55  ;;  %v882_v35 = vadd.f32 %v2825_v19, %v860_v27  ;;  %v812_v40 = vmul.f32 %v3204_v51, %v2880_v0  ;;  %v847_v45 = vmul.f32 %v3212_v37, %v2880_v0 }
 0x17a   :  { %v1306_v49 = vpack.c.bf16 %v897_v29, %v896_v11  ;;  %v883_v5 = vadd.f32 %v2825_v19, %v861_v47  ;;  %v827_v50 = vadd.f32 %v811_v23, %v791_v15  ;;  %v848_v63 = vmul.f32 %v3212_v37, %v2845_v61 }
 0x17b   :  { %1886 = vmatmul.mubr.msk.bf16.gmra.mrb[4].mxu0 %vm1052_vm4, %v1305_v62  ;;  %v898_v34 = vmax.f32 %v882_v35, 0.0  ;;  %v828_v16 = vadd.f32 %v812_v40, %v792_v13  ;;  %v793_v36 = vmul.f32 %v3203_v43, %v2880_v0  ;;  %v813_v21 = vmul.f32 %v3204_v51, %v2845_v61 }
 0x17c   :  { %1889 = vmatprep.mubr.msk.bf16.mxu0 %vm1052_vm4, %v1306_v49  ;;  %v899_v26 = vmax.f32 %v883_v5, 0.0  ;;  %v862_v4 = vadd.f32 %v847_v45, %v827_v50  ;;  %v865_v53 = vadd.f32 %v3228_v12, %v2882_v54  ;;  %v930_v37 = vmul.f32 %v3207_v7, %v2693_v41  ;;  %v2958_v54 = vld [vmem:[%s3138_s12] ss:$0 sm:$0xff]  ;;  %v3230_v12 = vld [vmem:[#allocation19_spill] sm:$0xff] }
 0x17d   :  { %v863_v33 = vadd.f32 %v848_v63, %v828_v16  ;;  %v829_v39 = vadd.f32 %v813_v21, %v793_v36  ;;  %v965_v22 = vmul.f32 %v3222_v1, %v2693_v41  ;;  %v966_v43 = vmul.f32 %v3222_v1, %v2647_v20  ;;  %v3231_v41 = vld [vmem:[#allocation18_spill] sm:$0xff] }
 0x17e   :  { %v1307_v52 = vpack.c.bf16 %v899_v26, %v898_v34  ;;  %v884_v51 = vadd.f32 %v2825_v19, %v862_v4  ;;  %v887_v57 = vadd.f32 %v2825_v19, %v865_v53  ;;  %v946_v32 = vadd.f32 %v930_v37, %v3230_v12 }
 0x17f   :  { %v885_v30 = vadd.f32 %v2825_v19, %v863_v33  ;;  %v864_v24 = vadd.f32 %v2878_v25, %v829_v39  ;;  %v980_v11 = vadd.f32 %v965_v22, %v3231_v41  ;;  %v982_v20 = vadd.f32 %v2737_v38, %v3232_v10 }
 0x180   :  { %v900_v44 = vmax.f32 %v884_v51, 0.0  ;;  %v903_v31 = vmax.f32 %v887_v57, 0.0  ;;  %v981_v55 = vadd.f32 %v966_v43, %v946_v32  ;;  %v1005_v27 = vadd.f32 %v2958_v54, %v2760_v46 }
 0x181   :  { %v901_v15 = vmax.f32 %v885_v30, 0.0  ;;  %v886_v29 = vadd.f32 %v2825_v19, %v864_v24  ;;  %v1002_v47 = vadd.f32 %v2958_v54, %v980_v11  ;;  %v1004_v13 = vadd.f32 %v2958_v54, %v982_v20 }
 0x182   :  { %v1003_v25 = vadd.f32 %v2958_v54, %v981_v55  ;;  %v1021_v23 = vmax.f32 %v1005_v27, 0.0  ;;  %v914_v62 = vmul.f32 %v3205_v17, %v2667_v42  ;;  %v915_v38 = vmul.f32 %v3205_v17, %v2744_v9 }
 0x183   :  { %1890 = vmatmul.mubr.msk.bf16.gmra.mrb[8].mxu0 %vm1052_vm4, %v1307_v52  ;;  %v1308_v35 = vpack.c.bf16 %v901_v15, %v900_v44  ;;  %v902_v46 = vmax.f32 %v886_v29, 0.0  ;;  %v1018_v40 = vmax.f32 %v1002_v47, 0.0  ;;  %v1020_v45 = vmax.f32 %v1004_v13, 0.0 }
 0x184   :  { %v1019_v19 = vmax.f32 %v1003_v25, 0.0  ;;  %v933_v49 = vmul.f32 %v3207_v7, %v2744_v9  ;;  %v934_v5 = vmul.f32 %v3207_v7, %v2777_v60  ;;  %v969_v50 = vmul.f32 %v3222_v1, %v2777_v60 }
 0x185   :  { %1893 = vmatprep.mubr.msk.bf16.mxu0 %vm1052_vm4, %v1308_v35  ;;  %v1309_v42 = vpack.c.bf16 %v903_v31, %v902_v46  ;;  %v1452_v63 = vpack.c.bf16 %v1021_v23, %v1020_v45  ;;  %v970_v34 = vmul.f32 %v3222_v1, %v2725_v58  ;;  %v916_v16 = vmul.f32 %v3205_v17, %v2777_v60 }
 0x186   :  { %v1451_v36 = vpack.c.bf16 %v1019_v19, %v1018_v40  ;;  %v949_v21 = vadd.f32 %v933_v49, %v914_v62  ;;  %v950_v26 = vadd.f32 %v934_v5, %v915_v38  ;;  %v935_v9 = vmul.f32 %v3207_v7, %v2725_v58 }
 0x187   :  { %v972_v4 = vmul.f32 0.0, %v3222_v1  ;;  %v938_v53 = vmul.f32 %v3207_v7, %v2815_v8  ;;  %v973_v37 = vmul.f32 %v3222_v1, %v2815_v8  ;;  %v974_v33 = vmul.f32 %v3222_v1, %v2811_v2 }
 0x188   :  { %v984_v39 = vadd.f32 %v969_v50, %v949_v21  ;;  %v985_v22 = vadd.f32 %v970_v34, %v950_v26  ;;  %v951_v60 = vadd.f32 %v935_v9, %v916_v16  ;;  %v919_v43 = vmul.f32 %v3205_v17, %v2815_v8 }
 0x189   :  { %v987_v52 = vadd.f32 %v972_v4, %v2771_v3  ;;  %v954_v58 = vadd.f32 %v938_v53, %v2836_v59  ;;  %v988_v51 = vadd.f32 %v973_v37, %v2848_v48  ;;  %v920_v57 = vmul.f32 %v3205_v17, %v2811_v2 }
 0x18a   :  { %v1006_v12 = vadd.f32 %v2958_v54, %v984_v39  ;;  %v1007_v32 = vadd.f32 %v2958_v54, %v985_v22  ;;  %v986_v30 = vadd.f32 %v2766_v6, %v951_v60  ;;  %v939_v24 = vmul.f32 %v3207_v7, %v2811_v2 }
 0x18b   :  { %1894 = vmatmul.mubr.msk.bf16.gmra.mrb[12].mxu0 %vm1052_vm4, %v1309_v42  ;;  %v1009_v3 = vadd.f32 %v2958_v54, %v987_v52  ;;  %v989_v8 = vadd.f32 %v974_v33, %v954_v58  ;;  %v1010_v59 = vadd.f32 %v2958_v54, %v988_v51  ;;  %v940_v48 = vmul.f32 %v3207_v7, %v2813_v14 }
 0x18c   :  { %1899 = vmatprep.mubr.msk.bf16.mxu0 %vm1052_vm4, %v1451_v36  ;;  %v1022_v41 = vmax.f32 %v1006_v12, 0.0  ;;  %v1023_v11 = vmax.f32 %v1007_v32, 0.0  ;;  %v1008_v10 = vadd.f32 %v2958_v54, %v986_v30  ;;  %v955_v6 = vadd.f32 %v939_v24, %v919_v43 }
 0x18d   :  { %v1025_v20 = vmax.f32 %v1009_v3, 0.0  ;;  %v1011_v2 = vadd.f32 %v2958_v54, %v989_v8  ;;  %v1026_v44 = vmax.f32 %v1010_v59, 0.0  ;;  %v956_v31 = vadd.f32 %v940_v48, %v920_v57 }
 0x18e   :  { %v1453_v55 = vpack.c.bf16 %v1023_v11, %v1022_v41  ;;  %v1024_v27 = vmax.f32 %v1008_v10, 0.0  ;;  %v975_v15 = vmul.f32 %v3222_v1, %v2813_v14  ;;  %v976_v29 = vmul.f32 %v3222_v1, %v2854_v28  ;;  %v3070_v11 = vld [vmem:[%s3143_s17] ss:$0 sm:$0xff]  ;;  %s2042_s17 = smov [#allocation5]  }
 0x18f   :  { %v1027_v47 = vmax.f32 %v1011_v2, 0.0  ;;  %v921_v13 = vmul.f32 %v3205_v17, %v2813_v14  ;;  %v922_v25 = vmul.f32 %v3205_v17, %v2854_v28  ;;  %v941_v23 = vmul.f32 %v3207_v7, %v2854_v28  ;;  %s1676_s27 = sshll.u32 %s2042_s17, 4  ;;  %s1677_s27 = int_to_ptr.vmem [resolvable:$true] %s1676_s27 }
 0x190   :  { %v1454_v62 = vpack.c.bf16 %v1025_v20, %v1024_v27  ;;  %v990_v38 = vadd.f32 %v975_v15, %v955_v6  ;;  %v991_v35 = vadd.f32 %v976_v29, %v956_v31  ;;  %v942_v46 = vmul.f32 %v3207_v7, %v2880_v0  ;;  %v1975_v29 = vld [vmem:[#allocation2 + $0x10] sm:$0xff]  ;;  %s2013_s29 = scalar_lea.vmem %s1677_s27, 2048  ;;  %p2018_p9 = scmp.lt.s32.totalorder %s1677_s27, %s1677_s27 }
 0x191   :  { %v1455_v40 = vpack.c.bf16 %v1027_v47, %v1026_v44  ;;  %v957_v45 = vadd.f32 %v941_v23, %v921_v13  ;;  %v977_v19 = vmul.f32 %v3222_v1, %v2880_v0  ;;  %v978_v14 = vmul.f32 %v3222_v1, %v2845_v61  ;;  %p2014_p8 = scmp.ne.s32.totalorder %s1677_s27, %s2013_s29  ;;  %p2019_p10 = scmp.lt.s32.totalorder %s2013_s29, %s2013_s29 }
 0x192   :  { %v1012_v49 = vadd.f32 %v2958_v54, %v990_v38  ;;  %v1013_v5 = vadd.f32 %v2958_v54, %v991_v35  ;;  %v958_v50 = vadd.f32 %v942_v46, %v922_v25  ;;  %v923_v28 = vmul.f32 %v3205_v17, %v2880_v0  ;;  %v1976_v25 = vld [vmem:[#allocation2] sm:$0xff]  ;;  %v1977_v35 = vld [vmem:[#allocation2 + $0x18] sm:$0xff] }
 0x193   :  { %1900 = vmatmul.mubr.msk.bf16.vlgmr.msra.gmra.mrb[0].mxu0 %vm1052_vm4, %v1452_v63  ;;  %v992_v42 = vadd.f32 %v977_v19, %v957_v45  ;;  %v943_v34 = vmul.f32 %v3207_v7, %v2845_v61  ;;  %v995_v16 = vadd.f32 %v972_v4, %v2884_v56  ;;  %v979_v9 = vmul.f32 %v3222_v1, %v2858_v18  ;;  %v1978_v45 = vld [vmem:[#allocation2 + $0x8] sm:$0xff]  ;;  %p2020_p11 = por %p2019_p10, %p2018_p9 }
 0x194   :  { %1903 = vmatprep.mubr.msk.bf16.mxu0 %vm1052_vm4, %v1453_v55  ;;  %v1028_v36 = vmax.f32 %v1012_v49, 0.0  ;;  %v1029_v21 = vmax.f32 %v1013_v5, 0.0  ;;  %v993_v26 = vadd.f32 %v978_v14, %v958_v50 }
 0x195   :  { %v1014_v53 = vadd.f32 %v2958_v54, %v992_v42  ;;  %v959_v37 = vadd.f32 %v943_v34, %v923_v28  ;;  %v1017_v17 = vadd.f32 %v2958_v54, %v995_v16  ;;  %p2021_p12 = pnand %p2020_p11, %p2014_p8 }
 0x196   :  { %v1456_v0 = vpack.c.bf16 %v1029_v21, %v1028_v36  ;;  %v1015_v63 = vadd.f32 %v2958_v54, %v993_v26 }
 0x197   :  { %v994_v33 = vadd.f32 %v979_v9, %v959_v37  ;;  %v1030_v7 = vmax.f32 %v1014_v53, 0.0  ;;  %v1033_v4 = vmax.f32 %v1017_v17, 0.0  ;;  %v1979_v53 = vld [vmem:[#allocation2 + $0x30] sm:$0xff] }
 0x198   :  { %v1031_v61 = vmax.f32 %v1015_v63, 0.0 }
 0x199   :  { %v1016_v56 = vadd.f32 %v2958_v54, %v994_v33 }
 0x19a   :  { %v1457_v39 = vpack.c.bf16 %v1031_v61, %v1030_v7  ;;  %v1981_v61 = vld [vmem:[#allocation2 + $0x38] sm:$0xff] }
 0x19b   :  { %1904 = vmatmul.mubr.msk.bf16.gmra.mrb[4].mxu0 %vm1052_vm4, %v1454_v62  ;;  %v1032_v22 = vmax.f32 %v1016_v56, 0.0 }
 0x19c   :  { %1907 = vmatprep.mubr.msk.bf16.mxu0 %vm1052_vm4, %v1455_v40 }
 0x19d   :  { %v1458_v1 = vpack.c.bf16 %v1033_v4, %v1032_v22 }
 0x1a3   :  { %1908 = vmatmul.mubr.msk.bf16.gmra.mrb[8].mxu0 %vm1052_vm4, %v1456_v0  ;;  %v1980_v0 = vld [vmem:[#allocation2 + $0x20] sm:$0xff] }
 0x1a4   :  { %1911 = vmatprep.mubr.msk.bf16.mxu0 %vm1052_vm4, %v1457_v39  ;;  %v1982_v39 = vld [vmem:[#allocation2 + $0x28] sm:$0xff] }
 0x1ab   :  { %1912 = vmatmul.mubr.msk.bf16.gmra.mrb[12].mxu0 %vm1052_vm4, %v1458_v1 }
 0x206   :  { %v1847_v18 = vpop.f32.mrb[32].mxu1 }
 0x207   :  { %v1115_v60 = vpop.f32.mrb[33].mxu1 }
 0x208   :  { %v1848_v43 = vpop.f32.mrb[34].mxu1 }
 0x209   :  { %v1118_v52 = vpop.f32.mrb[35].mxu1 }
 0x21f   :  { %v1851_v58 = vpop.f32.mrb[36].mxu1 }
 0x220   :  { %v1131_v54 = vpop.f32.mrb[37].mxu1 }
 0x221   :  { %v1852_v51 = vpop.f32.mrb[38].mxu1 }
 0x222   :  { %v1134_v57 = vpop.f32.mrb[39].mxu1 }
 0x22c   :  { %v1855_v12 = vpop.f32.mrb[40].mxu1 }
 0x22d   :  { %v3053_v32 = vpop.f32.mrb[41].mxu1 }
 0x22e   :  { %v3055_v30 = vpop.f32.mrb[42].mxu1 }
 0x22f   :  { %v3057_v24 = vpop.f32.mrb[43].mxu1 }
 0x237   :  { %v3059_v3 = vpop.f32.mrb[44].mxu1 }
 0x238   :  { %v3061_v8 = vpop.f32.mrb[45].mxu1 }
 0x239   :  { %v3063_v59 = vpop.f32.mrb[46].mxu1 }
 0x23a   :  { %v3065_v48 = vpop.f32.mrb[47].mxu1 }
 0x266   :  { %v1901_v41 = vpop.f32.mrb[0].mxu0 }
 0x267   :  { %v1915_v10 = vadd.f32 %v1901_v41, %v1847_v18  ;;  %v1521_v6 = vpop.f32.mrb[1].mxu0 }
 0x268   :  { %v1916_v20 = vadd.f32 %v1521_v6, %v1115_v60  ;;  %v1902_v2 = vpop.f32.mrb[2].mxu0  ;;  %v1983_v6 = vld [vmem:[#allocation2 + $0x50] sm:$0xff] }
 0x269   :  { %v1609_v44 = vadd.f32 %v1915_v10, %v3070_v11  ;;  %v1917_v31 = vadd.f32 %v1902_v2, %v1848_v43  ;;  %v1524_v55 = vpop.f32.mrb[3].mxu0 }
 0x26a   :  { %v1607_v27 = vadd.f32 %v1916_v20, %v3070_v11  ;;  %v1918_v15 = vadd.f32 %v1524_v55, %v1118_v52 }
 0x26b   :  { %v1625_v47 = vadd.f32 %v1975_v29, %v1609_v44  ;;  %v1610_v13 = vadd.f32 %v1917_v31, %v3070_v11  ;;  %v1984_v44 = vld [vmem:[#allocation2 + $0x40] sm:$0xff] }
 0x26c   :  { %v1623_v23 = vadd.f32 %v1976_v25, %v1607_v27  ;;  %v1608_v62 = vadd.f32 %v1918_v15, %v3070_v11  ;;  %v1985_v27 = vld [vmem:[#allocation2 + $0x58] sm:$0xff] }
 0x26d   :  { %v1641_v38 = vmax.f32 %v1625_v47, 0.0  ;;  %v1626_v46 = vadd.f32 %v1977_v35, %v1610_v13 }
 0x26e   :  { %v1639_v40 = vmax.f32 %v1623_v23, 0.0  ;;  %v1624_v19 = vadd.f32 %v1978_v45, %v1608_v62  ;;  %v1905_v14 = vpop.f32.mrb[4].mxu0 }
 0x26f   :  { %1657 = vst.msk [vmem:[#allocation5 + $0x10] sm:$0xff] %vm122_vm0, %v1641_v38  ;;  %v1642_v49 = vmax.f32 %v1626_v46, 0.0  ;;  %v1919_v5 = vadd.f32 %v1905_v14, %v1851_v58  ;;  %v1537_v50 = vpop.f32.mrb[5].mxu0  ;;  %v1987_v14 = vld [vmem:[#allocation2 + $0x70] sm:$0xff] }
 0x270   :  { %1655 = vst.msk [vmem:[#allocation5] sm:$0xff] %vm122_vm0, %v1639_v40  ;;  %v1640_v28 = vmax.f32 %v1624_v19, 0.0  ;;  %v1920_v42 = vadd.f32 %v1537_v50, %v1131_v54  ;;  %v1906_v34 = vpop.f32.mrb[6].mxu0  ;;  %v1988_v50 = vld [vmem:[#allocation2 + $0x60] sm:$0xff] }
 0x271   :  { %1658 = vst.msk [vmem:[#allocation5 + $0x18] sm:$0xff] %vm122_vm0, %v1642_v49  ;;  %v1613_v16 = vadd.f32 %v1919_v5, %v3070_v11  ;;  %v1921_v36 = vadd.f32 %v1906_v34, %v1852_v51  ;;  %v1540_v21 = vpop.f32.mrb[7].mxu0  ;;  %v1989_v34 = vld [vmem:[#allocation2 + $0x78] sm:$0xff] }
 0x272   :  { %1656 = vst.msk [vmem:[#allocation5 + $0x8] sm:$0xff] %vm122_vm0, %v1640_v28  ;;  %v1611_v26 = vadd.f32 %v1920_v42, %v3070_v11  ;;  %v1922_v9 = vadd.f32 %v1540_v21, %v1134_v57 }
 0x273   :  { %v1629_v37 = vadd.f32 %v1979_v53, %v1613_v16  ;;  %v1614_v17 = vadd.f32 %v1921_v36, %v3070_v11  ;;  %v1990_v36 = vld [vmem:[#allocation2 + $0x68] sm:$0xff] }
 0x274   :  { %v1627_v63 = vadd.f32 %v1980_v0, %v1611_v26  ;;  %v1612_v33 = vadd.f32 %v1922_v9, %v3070_v11 }
 0x275   :  { %v1645_v7 = vmax.f32 %v1629_v37, 0.0  ;;  %v1630_v56 = vadd.f32 %v1981_v61, %v1614_v17 }
 0x276   :  { %v1643_v4 = vmax.f32 %v1627_v63, 0.0  ;;  %v1628_v22 = vadd.f32 %v1982_v39, %v1612_v33  ;;  %v1909_v1 = vpop.f32.mrb[8].mxu0 }
 0x277   :  { %1661 = vst.msk [vmem:[#allocation5 + $0x30] sm:$0xff] %vm122_vm0, %v1645_v7  ;;  %v1646_v18 = vmax.f32 %v1630_v56, 0.0  ;;  %v1923_v60 = vadd.f32 %v1909_v1, %v1855_v12  ;;  %v1553_v43 = vpop.f32.mrb[9].mxu0 }
 0x278   :  { %1659 = vst.msk [vmem:[#allocation5 + $0x20] sm:$0xff] %vm122_vm0, %v1643_v4  ;;  %v1644_v52 = vmax.f32 %v1628_v22, 0.0  ;;  %v1924_v58 = vadd.f32 %v1553_v43, %v3053_v32  ;;  %v1910_v54 = vpop.f32.mrb[10].mxu0 }
 0x279   :  { %1662 = vst.msk [vmem:[#allocation5 + $0x38] sm:$0xff] %vm122_vm0, %v1646_v18  ;;  %v1617_v51 = vadd.f32 %v1923_v60, %v3070_v11  ;;  %v1925_v57 = vadd.f32 %v1910_v54, %v3055_v30  ;;  %v1556_v41 = vpop.f32.mrb[11].mxu0  ;;  %v1986_v30 = vld [vmem:[#allocation2 + $0x48] sm:$0xff] }
 0x27a   :  { %1660 = vst.msk [vmem:[#allocation5 + $0x28] sm:$0xff] %vm122_vm0, %v1644_v52  ;;  %v1615_v10 = vadd.f32 %v1924_v58, %v3070_v11  ;;  %v1926_v12 = vadd.f32 %v1556_v41, %v3057_v24 }
 0x27b   :  { %v1633_v20 = vadd.f32 %v1983_v6, %v1617_v51  ;;  %v1618_v2 = vadd.f32 %v1925_v57, %v3070_v11 }
 0x27c   :  { %v1631_v32 = vadd.f32 %v1984_v44, %v1615_v10  ;;  %v1616_v31 = vadd.f32 %v1926_v12, %v3070_v11 }
 0x27d   :  { %v1649_v55 = vmax.f32 %v1633_v20, 0.0  ;;  %v1634_v15 = vadd.f32 %v1985_v27, %v1618_v2 }
 0x27e   :  { %v1647_v29 = vmax.f32 %v1631_v32, 0.0  ;;  %v1632_v47 = vadd.f32 %v1986_v30, %v1616_v31  ;;  %v1913_v13 = vpop.f32.mrb[12].mxu0 }
 0x27f   :  { %1665 = vst.msk [vmem:[#allocation5 + $0x50] sm:$0xff] %vm122_vm0, %v1649_v55  ;;  %v1650_v25 = vmax.f32 %v1634_v15, 0.0  ;;  %v1927_v24 = vadd.f32 %v1913_v13, %v3059_v3  ;;  %v1569_v23 = vpop.f32.mrb[13].mxu0 }
 0x280   :  { %1663 = vst.msk [vmem:[#allocation5 + $0x40] sm:$0xff] %vm122_vm0, %v1647_v29  ;;  %v1648_v62 = vmax.f32 %v1632_v47, 0.0  ;;  %v1928_v38 = vadd.f32 %v1569_v23, %v3061_v8  ;;  %v1914_v35 = vpop.f32.mrb[14].mxu0 }
 0x281   :  { %1666 = vst.msk [vmem:[#allocation5 + $0x58] sm:$0xff] %vm122_vm0, %v1650_v25  ;;  %v1621_v46 = vadd.f32 %v1927_v24, %v3070_v11  ;;  %v1929_v40 = vadd.f32 %v1914_v35, %v3063_v59  ;;  %v1572_v45 = vpop.f32.mrb[15].mxu0 }
 0x282   :  { %1664 = vst.msk [vmem:[#allocation5 + $0x48] sm:$0xff] %vm122_vm0, %v1648_v62  ;;  %v1619_v19 = vadd.f32 %v1928_v38, %v3070_v11  ;;  %v1930_v3 = vadd.f32 %v1572_v45, %v3065_v48 }
 0x283   :  { %v1637_v49 = vadd.f32 %v1987_v14, %v1621_v46  ;;  %v1622_v5 = vadd.f32 %v1929_v40, %v3070_v11 }
 0x284   :  { %v1635_v8 = vadd.f32 %v1988_v50, %v1619_v19  ;;  %v1620_v28 = vadd.f32 %v1930_v3, %v3070_v11 }
 0x285   :  { %v1653_v42 = vmax.f32 %v1637_v49, 0.0  ;;  %v1638_v16 = vadd.f32 %v1989_v34, %v1622_v5 }
 0x286   :  { %v1651_v59 = vmax.f32 %v1635_v8, 0.0  ;;  %v1636_v21 = vadd.f32 %v1990_v36, %v1620_v28 }
 0x287   :  { %1669 = vst.msk [vmem:[#allocation5 + $0x70] sm:$0xff] %vm122_vm0, %v1653_v42  ;;  %v1654_v26 = vmax.f32 %v1638_v16, 0.0 }
 0x288   :  { %1667 = vst.msk [vmem:[#allocation5 + $0x60] sm:$0xff] %vm122_vm0, %v1651_v59  ;;  %v1652_v48 = vmax.f32 %v1636_v21, 0.0 }
 0x289   :  { %1670 = vst.msk [vmem:[#allocation5 + $0x78] sm:$0xff] %vm122_vm0, %v1654_v26 }
 0x28a   :  { %1668 = vst.msk [vmem:[#allocation5 + $0x68] sm:$0xff] %vm122_vm0, %v1652_v48 }
 0x28b   :  { %2024 = shalt.err (!%p2021_p12)
}
 0x28c   :  { %s2025_s13 = scalar_lea.hbm %s3144_s18, 2048 }
 0x28d   :  { %p2026_p13 = scmp.ne.s32.totalorder %s3144_s18, %s2025_s13  ;;  %p2029_p0 = scmp.lt.u32.totalorder %s2025_s13, %s3144_s18 }
 0x28f   :  { %p2031_p1 = pnand %p2029_p0, %p2026_p13 }
 0x291   :  { %2034 = shalt.err (!%p2031_p1)
}
 0x292   :  { %1682 = dma.vmem_to_hbm [thread:$0]  %s1677_s27, 2048, %s3144_s18, [#allocation4], %s2040_s23, %s2040_s23, %s2041_s24  }
 0x293   :  { %2037 = dma.done.wait [#allocation4], 2048  }
 0x294   :  { %2038 = vsyncadd [#allocation4], 4294965248 }
 0x295   :  { %1686 = vsyncpa [#allocation3], 1 }
 0x296   :  { %1687 = vsyncpa [#allocation4], 1 }

</bundles_post_ra>
